<compile_context>
chip_gen: v7x
topology: tpu7x:2x2x1
jax: 0.10.0
libtpu: 0.0.40
codegen_flags: <defaults>
</compile_context>

<pallas_src>
import functools
import math

import jax
import jax.numpy as jnp
from jax.experimental import pallas as pl
from jax.experimental.pallas import tpu as pltpu

NEG_INF = -1e9
LN_EPS = 1e-5
# Scoped-VMEM budget for the fused kernels.  Safe on v5e/v6e (128 MiB physical) and within
# v7x's 64 MiB physical.  TODO(synk): re-derive per generation / model size.
VMEM_LIMIT = 64 * 1024 * 1024
FFN_TM_PREFERRED = 256   # bump to 512 on v6e (128 MiB VMEM); keep 256 for v7x (64 MiB).
ATTN_TQ_PREFERRED = 256  # bounds the [tq, Lk] f32 score matrix (vreg / VMEM pressure).


def _tile_dim(dim, preferred, align):
    """Largest tile <= preferred that is a multiple of `align` and divides `dim`; else full dim."""
    t = min(preferred, (dim // align) * align)
    while t >= align:
        if dim % t == 0:
            return t
        t -= align
    return dim


def _const_spec(shape):
    """Resident parameter block: constant index_map + single buffering (never re-fetched,
    so default double-buffering would only waste VMEM)."""
    return pl.BlockSpec(shape, lambda *_: (0,) * len(shape), pipeline_mode=pl.Buffered(1))


# ----------------------------- fused attention sublayer -----------------------------

def _mha_ln_body(xq, xkv, m, wq, wk, wv, bq, bk, bv, wo, bo, g, beta, *, nhead, scale, eps):
    """xq: [tq, E] f32, xkv: [Lk, E] f32, m: [tq, Lk] additive mask.  Returns [tq, E] f32."""
    E = xq.shape[-1]
    dh = E // nhead

    xq_bf = xq.astype(jnp.bfloat16)
    xkv_bf = xkv.astype(jnp.bfloat16)

    # Separate Q / K / V projections (K = E contraction depth on the MXU), bf16 weights.
    # Attention scale is folded into q (tiny [tq, E] VPU op instead of scaling every score tile).
    q = (jnp.dot(xq_bf, wq, preferred_element_type=jnp.float32) + bq) * scale
    k = jnp.dot(xkv_bf, wk, preferred_element_type=jnp.float32) + bk
    v = jnp.dot(xkv_bf, wv, preferred_element_type=jnp.float32) + bv

    # Per-head softmax / PV; contexts concatenated so the output projection is ONE
    # [tq, E] @ [E, E] MXU matmul (no nhead matmuls with K=dh underfilling the systolic depth).
    # TODO(synk): batch several batch elements per grid step when Lq/Lk are small to fill
    # the 128/256-row MXU in the projections.
    ctx_parts = []
    for h in range(nhead):
        lo, hi = h * dh, (h + 1) * dh
        qh = q[:, lo:hi].astype(jnp.bfloat16)
        kh = k[:, lo:hi].astype(jnp.bfloat16)
        vh = v[:, lo:hi].astype(jnp.bfloat16)
        s = jax.lax.dot_general(qh, kh, (((1,), (1,)), ((), ())),
                                preferred_element_type=jnp.float32)
        s = s + m
        s = s - jnp.max(s, axis=-1, keepdims=True)
        p = jnp.exp(s)
        p = p * pl.reciprocal(jnp.sum(p, axis=-1, keepdims=True), approx=True)
        ctx_parts.append(jnp.dot(p.astype(jnp.bfloat16), vh,
                                 preferred_element_type=jnp.float32))
    ctx = ctx_parts[0] if nhead == 1 else jnp.concatenate(ctx_parts, axis=-1)   # [tq, E]
    o = jnp.dot(ctx.astype(jnp.bfloat16), wo, preferred_element_type=jnp.float32) + bo

    # Residual + LayerNorm (post-norm, PyTorch default), all f32.
    y = xq + o
    mu = jnp.mean(y, axis=-1, keepdims=True)
    var = jnp.mean(jnp.square(y - mu), axis=-1, keepdims=True)
    yhat = (y - mu) * jax.lax.rsqrt(var + eps)
    return yhat * g + beta


def _self_attn_kernel(x_ref, am_ref, pad_ref,
                      wq_ref, wk_ref, wv_ref, bq_ref, bk_ref, bv_ref,
                      wo_ref, bo_ref, g_ref, beta_ref, o_ref,
                      *, nhead, scale, eps, tq):
    # x DMA'd ONCE per batch element; K/V, residual and the Q tile all come from this block.
    xkv = x_ref[0]                                            # [L, E]
    if tq == xkv.shape[0]:
        xq = xkv                                              # single Lq tile: no slice needed
    else:
        start = pl.multiple_of(pl.program_id(1) * tq, tq)     # tq is a multiple of 8 here
        xq = x_ref[0, pl.ds(start, tq), :]                    # [tq, E] query rows
    m = am_ref[...] + pad_ref[0]                              # shared mask tile + per-batch pad row
    y = _mha_ln_body(xq, xkv, m,
                     wq_ref[...], wk_ref[...], wv_ref[...],
                     bq_ref[...], bk_ref[...], bv_ref[...],
                     wo_ref[...], bo_ref[...], g_ref[...], beta_ref[...],
                     nhead=nhead, scale=scale, eps=eps)
    o_ref[0] = y.astype(o_ref.dtype)


def _cross_attn_kernel(xq_ref, xkv_ref, am_ref, pad_ref,
                       wq_ref, wk_ref, wv_ref, bq_ref, bk_ref, bv_ref,
                       wo_ref, bo_ref, g_ref, beta_ref, o_ref,
                       *, nhead, scale, eps):
    xq = xq_ref[0]                                            # [tq, E]
    xkv = xkv_ref[0]                                          # [Lk, E]
    m = am_ref[...] + pad_ref[0]                              # [tq, Lk]
    y = _mha_ln_body(xq, xkv, m,
                     wq_ref[...], wk_ref[...], wv_ref[...],
                     bq_ref[...], bk_ref[...], bv_ref[...],
                     wo_ref[...], bo_ref[...], g_ref[...], beta_ref[...],
                     nhead=nhead, scale=scale, eps=eps)
    o_ref[0] = y.astype(o_ref.dtype)


def self_attn_block(x, attn_mask, pad_bias, ap, ln, nhead):
    """Fused self-attention sublayer: LayerNorm(x + MHA(x, x)).

    attn_mask: shared [L, L] additive f32 mask; pad_bias: per-batch [B, 1, L] additive f32."""
    B, L, E = x.shape
    dh = E // nhead
    tq = _tile_dim(L, ATTN_TQ_PREFERRED, 8)
    nq = L // tq
    kernel = functools.partial(_self_attn_kernel, nhead=nhead,
                               scale=1.0 / math.sqrt(dh), eps=LN_EPS, tq=tq)
    return pl.pallas_call(
        kernel,
        out_shape=jax.ShapeDtypeStruct((B, L, E), x.dtype),
        grid=(B, nq),
        in_specs=[
            pl.BlockSpec((1, L, E), lambda b, qi: (b, 0, 0)),   # x (once per batch element)
            pl.BlockSpec((tq, L), lambda b, qi: (qi, 0)),       # shared attn mask tile
            pl.BlockSpec((1, 1, L), lambda b, qi: (b, 0, 0)),   # per-batch key-padding bias row
            _const_spec((E, E)), _const_spec((E, E)), _const_spec((E, E)),   # wq, wk, wv (bf16)
            _const_spec((1, E)), _const_spec((1, E)), _const_spec((1, E)),   # bq, bk, bv
            _const_spec((E, E)), _const_spec((1, E)),                        # wo (bf16), bo
            _const_spec((1, E)), _const_spec((1, E)),                        # LN gamma, beta
        ],
        out_specs=pl.BlockSpec((1, tq, E), lambda b, qi: (b, qi, 0)),
        compiler_params=pltpu.CompilerParams(
            dimension_semantics=("parallel", "parallel"),
            vmem_limit_bytes=VMEM_LIMIT),
    )(x, attn_mask, pad_bias,
      ap["wq"], ap["wk"], ap["wv"],
      ap["bq"].reshape(1, E), ap["bk"].reshape(1, E), ap["bv"].reshape(1, E),
      ap["wo"], ap["bo"].reshape(1, E),
      ln["g"].reshape(1, E), ln["b"].reshape(1, E))


def cross_attn_block(x_q, x_kv, attn_mask, pad_bias, ap, ln, nhead):
    """Fused cross-attention sublayer: LayerNorm(x_q + MHA(x_q, x_kv))."""
    B, Lq, E = x_q.shape
    Lk = x_kv.shape[1]
    dh = E // nhead
    tq = _tile_dim(Lq, ATTN_TQ_PREFERRED, 8)
    nq = Lq // tq
    kernel = functools.partial(_cross_attn_kernel, nhead=nhead,
                               scale=1.0 / math.sqrt(dh), eps=LN_EPS)
    return pl.pallas_call(
        kernel,
        out_shape=jax.ShapeDtypeStruct((B, Lq, E), x_q.dtype),
        grid=(B, nq),
        in_specs=[
            pl.BlockSpec((1, tq, E), lambda b, qi: (b, qi, 0)),   # query rows
            pl.BlockSpec((1, Lk, E), lambda b, qi: (b, 0, 0)),    # memory (once per batch elt)
            pl.BlockSpec((tq, Lk), lambda b, qi: (qi, 0)),        # shared attn mask tile
            pl.BlockSpec((1, 1, Lk), lambda b, qi: (b, 0, 0)),    # per-batch key-padding bias row
            _const_spec((E, E)), _const_spec((E, E)), _const_spec((E, E)),
            _const_spec((1, E)), _const_spec((1, E)), _const_spec((1, E)),
            _const_spec((E, E)), _const_spec((1, E)),
            _const_spec((1, E)), _const_spec((1, E)),
        ],
        out_specs=pl.BlockSpec((1, tq, E), lambda b, qi: (b, qi, 0)),
        compiler_params=pltpu.CompilerParams(
            dimension_semantics=("parallel", "parallel"),
            vmem_limit_bytes=VMEM_LIMIT),
    )(x_q, x_kv, attn_mask, pad_bias,
      ap["wq"], ap["wk"], ap["wv"],
      ap["bq"].reshape(1, E), ap["bk"].reshape(1, E), ap["bv"].reshape(1, E),
      ap["wo"], ap["bo"].reshape(1, E),
      ln["g"].reshape(1, E), ln["b"].reshape(1, E))


# ----------------------------- fused FFN sublayer -----------------------------

def _ffn_ln_kernel(x_ref, w1_ref, b1_ref, w2_ref, b2_ref, g_ref, beta_ref, o_ref, *, eps):
    x = x_ref[...]                                                         # [tm, E] f32
    h = jnp.dot(x.astype(jnp.bfloat16), w1_ref[...],
                preferred_element_type=jnp.float32) + b1_ref[...]
    h = jnp.maximum(h, 0.0)
    y = jnp.dot(h.astype(jnp.bfloat16), w2_ref[...],
                preferred_element_type=jnp.float32) + b2_ref[...]
    y = x + y
    mu = jnp.mean(y, axis=-1, keepdims=True)
    var = jnp.mean(jnp.square(y - mu), axis=-1, keepdims=True)
    yhat = (y - mu) * jax.lax.rsqrt(var + eps)
    o_ref[...] = (yhat * g_ref[...] + beta_ref[...]).astype(o_ref.dtype)


def ffn_block(x, p, ln):
    """Fused FFN sublayer: LayerNorm(x + W2(relu(W1 x)))."""
    B, L, E = x.shape
    F = p["w1"].shape[1]
    M = B * L
    x2 = x.reshape(M, E)
    tm = _tile_dim(M, FFN_TM_PREFERRED, 8)
    y = pl.pallas_call(
        functools.partial(_ffn_ln_kernel, eps=LN_EPS),
        out_shape=jax.ShapeDtypeStruct((M, E), x.dtype),
        grid=(M // tm,),
        in_specs=[
            pl.BlockSpec((tm, E), lambda i: (i, 0)),
            _const_spec((E, F)), _const_spec((1, F)),     # w1 (bf16), b1
            _const_spec((F, E)), _const_spec((1, E)),     # w2 (bf16), b2
            _const_spec((1, E)), _const_spec((1, E)),     # LN gamma, beta
        ],
        out_specs=pl.BlockSpec((tm, E), lambda i: (i, 0)),
        compiler_params=pltpu.CompilerParams(
            dimension_semantics=("parallel",),
            vmem_limit_bytes=VMEM_LIMIT),
    )(x2, p["w1"], p["b1"].reshape(1, F), p["w2"], p["b2"].reshape(1, E),
      ln["g"].reshape(1, E), ln["b"].reshape(1, E))
    return y.reshape(B, L, E)


# ----------------------------- plain LayerNorm (final encoder/decoder norm) ---------------

def _ln_kernel(x_ref, g_ref, beta_ref, o_ref, *, eps):
    x = x_ref[...]
    mu = jnp.mean(x, axis=-1, keepdims=True)
    var = jnp.mean(jnp.square(x - mu), axis=-1, keepdims=True)
    xhat = (x - mu) * jax.lax.rsqrt(var + eps)
    o_ref[...] = (xhat * g_ref[...] + beta_ref[...]).astype(o_ref.dtype)


def layer_norm(x3, ln):
    B, L, E = x3.shape
    M = B * L
    x2 = x3.reshape(M, E)
    tm = _tile_dim(M, 512, 8)
    y = pl.pallas_call(
        functools.partial(_ln_kernel, eps=LN_EPS),
        out_shape=jax.ShapeDtypeStruct((M, E), x3.dtype),
        grid=(M // tm,),
        in_specs=[
            pl.BlockSpec((tm, E), lambda i: (i, 0)),
            _const_spec((1, E)), _const_spec((1, E)),
        ],
        out_specs=pl.BlockSpec((tm, E), lambda i: (i, 0)),
        compiler_params=pltpu.CompilerParams(dimension_semantics=("parallel",)),
    )(x2, ln["g"].reshape(1, E), ln["b"].reshape(1, E))
    return y.reshape(B, L, E)


# ----------------------------- tiled linear (generator) -----------------------------

def _linear_kernel(x_ref, w_ref, b_ref, o_ref):
    y = jnp.dot(x_ref[...].astype(jnp.bfloat16), w_ref[...],
                preferred_element_type=jnp.float32) + b_ref[...]
    o_ref[...] = y.astype(o_ref.dtype)


def linear(x, w, b):
    """x: [M, K] f32, w: [K, N] bf16, b: [N] f32 -> [M, N].  Weight-tile axis (j) is the
    OUTER grid axis so gen_w (the largest tensor) streams from HBM exactly once.
    # TODO(synk): add a K grid axis + f32 accumulator scratch if K ever exceeds a few K."""
    M, K = x.shape
    N = w.shape[1]
    tm = _tile_dim(M, 256, 8)
    tn = _tile_dim(N, 512, 128)
    return pl.pallas_call(
        _linear_kernel,
        out_shape=jax.ShapeDtypeStruct((M, N), x.dtype),
        grid=(N // tn, M // tm),
        in_specs=[
            pl.BlockSpec((tm, K), lambda j, i: (i, 0)),
            pl.BlockSpec((K, tn), lambda j, i: (0, j)),
            pl.BlockSpec((1, tn), lambda j, i: (0, j)),
        ],
        out_specs=pl.BlockSpec((tm, tn), lambda j, i: (i, j)),
        compiler_params=pltpu.CompilerParams(
            dimension_semantics=("parallel", "parallel"),
            vmem_limit_bytes=VMEM_LIMIT),
    )(x, w, b.reshape(1, N))


# ----------------------------- model wiring (plain JAX glue) -----------------------------

def seq2seq_transformer_forward(params, cfg, src, trg, src_mask, tgt_mask,
                                src_padding_mask, tgt_padding_mask,
                                memory_key_padding_mask):
    E = cfg["emb_size"]
    nhead = cfg["nhead"]
    B, S = src.shape
    _, T = trg.shape
    scale = math.sqrt(E)

    # Token embedding * sqrt(E) + positional encoding: plain JAX (XLA fuses gather+scale+add;
    # a standalone elementwise kernel would only add an extra HBM round trip).
    # TODO(synk): nn.Dropout layers are identity here (inference / eval semantics).
    src_x = params["src_emb"][src] * scale + params["pe"][:, :S]
    tgt_x = params["tgt_emb"][trg] * scale + params["pe"][:, :T]

    def pad_bias(mask):   # bool [B, Lk] (True = ignore) -> additive f32 [B, 1, Lk]
        return jnp.where(mask, NEG_INF, 0.0).astype(jnp.float32)[:, None, :]

    src_pad = pad_bias(src_padding_mask)
    tgt_pad = pad_bias(tgt_padding_mask)
    mem_pad = pad_bias(memory_key_padding_mask)
    src_m = src_mask.astype(jnp.float32)                # [S, S] shared additive mask
    tgt_m = tgt_mask.astype(jnp.float32)                # [T, T] causal mask
    mem_m = jnp.zeros((T, S), jnp.float32)              # no cross attn mask

    # Encoder (post-norm, relu — PyTorch defaults), final encoder LayerNorm.
    mem = src_x
    for p in params["enc_layers"]:
        mem = self_attn_block(mem, src_m, src_pad, p["self_attn"], p["ln1"], nhead)
        mem = ffn_block(mem, p, p["ln2"])
    mem = layer_norm(mem, params["enc_norm"])

    # Decoder, final decoder LayerNorm.
    out = tgt_x
    for p in params["dec_layers"]:
        out = self_attn_block(out, tgt_m, tgt_pad, p["self_attn"], p["ln1"], nhead)
        out = cross_attn_block(out, mem, mem_m, mem_pad, p["cross_attn"], p["ln2"], nhead)
        out = ffn_block(out, p, p["ln3"])
    out = layer_norm(out, params["dec_norm"])

    logits = linear(out.reshape(B * T, E), params["gen_w"], params["gen_b"])
    return logits.reshape(B, T, cfg["tgt_vocab"])


# ----------------------------- deterministic parameter init -----------------------------

def init_params(key, cfg):
    E, F = cfg["emb_size"], cfg["dim_ff"]
    Vs, Vt = cfg["src_vocab"], cfg["tgt_vocab"]
    max_len = cfg["max_len"]
    keys = iter(jax.random.split(key, 256))

    def w32(*shape, scale=0.1):
        return jax.random.normal(next(keys), shape, jnp.float32) * scale

    def wbf(*shape, scale=0.1):
        # Matmul weights are shipped/stored as bf16 (half the HBM->VMEM bytes, no per-step cast).
        return w32(*shape, scale=scale).astype(jnp.bfloat16)

    def zeros(*shape):
        return jnp.zeros(shape, jnp.float32)

    def attn_p():
        return dict(wq=wbf(E, E), wk=wbf(E, E), wv=wbf(E, E),
                    bq=zeros(E), bk=zeros(E), bv=zeros(E),
                    wo=wbf(E, E), bo=zeros(E))

    def ln_p():
        return dict(g=jnp.ones((E,), jnp.float32), b=zeros(E))

    enc_layers = [dict(self_attn=attn_p(), ln1=ln_p(), ln2=ln_p(),
                       w1=wbf(E, F), b1=zeros(F), w2=wbf(F, E), b2=zeros(E))
                  for _ in range(cfg["num_encoder_layers"])]
    dec_layers = [dict(self_attn=attn_p(), cross_attn=attn_p(),
                       ln1=ln_p(), ln2=ln_p(), ln3=ln_p(),
                       w1=wbf(E, F), b1=zeros(F), w2=wbf(F, E), b2=zeros(E))
                  for _ in range(cfg["num_decoder_layers"])]

    # sinusoidal positional-encoding buffer, shape [1, max_len, E]
    position = jnp.arange(max_len, dtype=jnp.float32)[:, None]
    div_term = jnp.exp(jnp.arange(0, E, 2, dtype=jnp.float32) * (-math.log(10000.0) / E))
    pe = jnp.zeros((max_len, E), jnp.float32)
    pe = pe.at[:, 0::2].set(jnp.sin(position * div_term))
    pe = pe.at[:, 1::2].set(jnp.cos(position * div_term))

    return dict(
        src_emb=w32(Vs, E, scale=1.0),
        tgt_emb=w32(Vt, E, scale=1.0),
        pe=pe[None],
        enc_layers=enc_layers, dec_layers=dec_layers,
        enc_norm=ln_p(), dec_norm=ln_p(),
        gen_w=wbf(E, Vt), gen_b=zeros(Vt),
    )


# ----------------------------- demo -----------------------------

if __name__ == "__main__":
    cfg = dict(num_encoder_layers=2, num_decoder_layers=2, emb_size=32, nhead=4,
               src_vocab=48, tgt_vocab=48, dim_ff=64, max_len=64)

    key = jax.random.PRNGKey(0)
    pkey, skey, tkey = jax.random.split(key, 3)
    params = init_params(pkey, cfg)

    B, S, T = 2, 12, 8
    src = jax.random.randint(skey, (B, S), 0, cfg["src_vocab"])
    trg = jax.random.randint(tkey, (B, T), 0, cfg["tgt_vocab"])

    src_mask = jnp.zeros((S, S), jnp.float32)                                # no src attn mask
    causal = jnp.triu(jnp.ones((T, T), dtype=bool), k=1)
    tgt_mask = jnp.where(causal, NEG_INF, 0.0).astype(jnp.float32)           # causal tgt mask

    src_lens = jnp.array([S, S - 3])
    tgt_lens = jnp.array([T, T - 2])
    src_padding_mask = jnp.arange(S)[None, :] >= src_lens[:, None]           # True = pad
    tgt_padding_mask = jnp.arange(T)[None, :] >= tgt_lens[:, None]
    memory_key_padding_mask = src_padding_mask

    logits = seq2seq_transformer_forward(
        params, cfg, src, trg, src_mask, tgt_mask,
        src_padding_mask, tgt_padding_mask, memory_key_padding_mask)
    logits = jax.block_until_ready(logits)

    assert logits.shape == (B, T, cfg["tgt_vocab"]), logits.shape
    assert bool(jnp.all(jnp.isfinite(logits)))
    print("KERNEL_OK")
</pallas_src>

<mosaic_0001>
module attributes {stable_mosaic.version = 11 : i64} {
  func.func @_self_attn_kernel(%arg0: i32, %arg1: i32, %arg2: memref<1x12x32xf32, #tpu.memory_space<vmem>>, %arg3: memref<12x12xf32, #tpu.memory_space<vmem>>, %arg4: memref<1x1x12xf32, #tpu.memory_space<vmem>>, %arg5: memref<32x32xbf16, #tpu.memory_space<vmem>>, %arg6: memref<32x32xbf16, #tpu.memory_space<vmem>>, %arg7: memref<32x32xbf16, #tpu.memory_space<vmem>>, %arg8: memref<1x32xf32, #tpu.memory_space<vmem>>, %arg9: memref<1x32xf32, #tpu.memory_space<vmem>>, %arg10: memref<1x32xf32, #tpu.memory_space<vmem>>, %arg11: memref<32x32xbf16, #tpu.memory_space<vmem>>, %arg12: memref<1x32xf32, #tpu.memory_space<vmem>>, %arg13: memref<1x32xf32, #tpu.memory_space<vmem>>, %arg14: memref<1x32xf32, #tpu.memory_space<vmem>>, %arg15: memref<1x12x32xf32, #tpu.memory_space<vmem>>) attributes {dimension_semantics = [#tpu.dimension_semantics<parallel>, #tpu.dimension_semantics<parallel>], iteration_bounds = array<i64: 2, 1>, scalar_prefetch = 0 : i64, scratch_operands = 0 : i64, tpu.core_type = #tpu.core_type<tc>, window_params = [{transform_indices = @transform_0, window_bounds = array<i64: 1, 12, 32>}, {transform_indices = @transform_1, window_bounds = array<i64: 12, 12>}, {transform_indices = @transform_2, window_bounds = array<i64: 1, 1, 12>}, {pipeline_mode = #tpu.pipeline_mode<synchronous>, transform_indices = @transform_3, window_bounds = array<i64: 32, 32>}, {pipeline_mode = #tpu.pipeline_mode<synchronous>, transform_indices = @transform_4, window_bounds = array<i64: 32, 32>}, {pipeline_mode = #tpu.pipeline_mode<synchronous>, transform_indices = @transform_5, window_bounds = array<i64: 32, 32>}, {pipeline_mode = #tpu.pipeline_mode<synchronous>, transform_indices = @transform_6, window_bounds = array<i64: 1, 32>}, {pipeline_mode = #tpu.pipeline_mode<synchronous>, transform_indices = @transform_7, window_bounds = array<i64: 1, 32>}, {pipeline_mode = #tpu.pipeline_mode<synchronous>, transform_indices = @transform_8, window_bounds = array<i64: 1, 32>}, {pipeline_mode = #tpu.pipeline_mode<synchronous>, transform_indices = @transform_9, window_bounds = array<i64: 32, 32>}, {pipeline_mode = #tpu.pipeline_mode<synchronous>, transform_indices = @transform_10, window_bounds = array<i64: 1, 32>}, {pipeline_mode = #tpu.pipeline_mode<synchronous>, transform_indices = @transform_11, window_bounds = array<i64: 1, 32>}, {pipeline_mode = #tpu.pipeline_mode<synchronous>, transform_indices = @transform_12, window_bounds = array<i64: 1, 32>}, {transform_indices = @transform_13, window_bounds = array<i64: 1, 12, 32>}]} {
    %c0 = arith.constant 0 : index
    %c0_0 = arith.constant 0 : index
    %c0_1 = arith.constant 0 : index
    %0 = vector.load %arg2[%c0, %c0_0, %c0_1] : memref<1x12x32xf32, #tpu.memory_space<vmem>>, vector<1x12x32xf32>
    %1 = vector.shape_cast %0 : vector<1x12x32xf32> to vector<12x32xf32>
    %c0_2 = arith.constant 0 : index
    %c0_3 = arith.constant 0 : index
    %2 = vector.load %arg3[%c0_2, %c0_3] : memref<12x12xf32, #tpu.memory_space<vmem>>, vector<12x12xf32>
    %c0_4 = arith.constant 0 : index
    %c0_5 = arith.constant 0 : index
    %c0_6 = arith.constant 0 : index
    %3 = vector.load %arg4[%c0_4, %c0_5, %c0_6] : memref<1x1x12xf32, #tpu.memory_space<vmem>>, vector<1x1x12xf32>
    %4 = vector.shape_cast %3 : vector<1x1x12xf32> to vector<1x12xf32>
    %5 = vector.broadcast %4 : vector<1x12xf32> to vector<12x12xf32>
    %6 = arith.addf %2, %5 : vector<12x12xf32>
    %c0_7 = arith.constant 0 : index
    %c0_8 = arith.constant 0 : index
    %7 = vector.load %arg5[%c0_7, %c0_8] : memref<32x32xbf16, #tpu.memory_space<vmem>>, vector<32x32xbf16>
    %c0_9 = arith.constant 0 : index
    %c0_10 = arith.constant 0 : index
    %8 = vector.load %arg6[%c0_9, %c0_10] : memref<32x32xbf16, #tpu.memory_space<vmem>>, vector<32x32xbf16>
    %c0_11 = arith.constant 0 : index
    %c0_12 = arith.constant 0 : index
    %9 = vector.load %arg7[%c0_11, %c0_12] : memref<32x32xbf16, #tpu.memory_space<vmem>>, vector<32x32xbf16>
    %c0_13 = arith.constant 0 : index
    %c0_14 = arith.constant 0 : index
    %10 = vector.load %arg8[%c0_13, %c0_14] : memref<1x32xf32, #tpu.memory_space<vmem>>, vector<1x32xf32>
    %c0_15 = arith.constant 0 : index
    %c0_16 = arith.constant 0 : index
    %11 = vector.load %arg9[%c0_15, %c0_16] : memref<1x32xf32, #tpu.memory_space<vmem>>, vector<1x32xf32>
    %c0_17 = arith.constant 0 : index
    %c0_18 = arith.constant 0 : index
    %12 = vector.load %arg10[%c0_17, %c0_18] : memref<1x32xf32, #tpu.memory_space<vmem>>, vector<1x32xf32>
    %c0_19 = arith.constant 0 : index
    %c0_20 = arith.constant 0 : index
    %13 = vector.load %arg11[%c0_19, %c0_20] : memref<32x32xbf16, #tpu.memory_space<vmem>>, vector<32x32xbf16>
    %c0_21 = arith.constant 0 : index
    %c0_22 = arith.constant 0 : index
    %14 = vector.load %arg12[%c0_21, %c0_22] : memref<1x32xf32, #tpu.memory_space<vmem>>, vector<1x32xf32>
    %c0_23 = arith.constant 0 : index
    %c0_24 = arith.constant 0 : index
    %15 = vector.load %arg13[%c0_23, %c0_24] : memref<1x32xf32, #tpu.memory_space<vmem>>, vector<1x32xf32>
    %c0_25 = arith.constant 0 : index
    %c0_26 = arith.constant 0 : index
    %16 = vector.load %arg14[%c0_25, %c0_26] : memref<1x32xf32, #tpu.memory_space<vmem>>, vector<1x32xf32>
    %17 = arith.truncf %1 : vector<12x32xf32> to vector<12x32xbf16>
    %18 = arith.truncf %1 : vector<12x32xf32> to vector<12x32xbf16>
    %cst = arith.constant dense<0.000000e+00> : vector<12x32xf32>
    %19 = tpu.matmul %17, %7, %cst {dimension_numbers = #tpu.dot_dimension_numbers<[1], [0], [0], [1], [0, 0, 1, 1], [], []>} : vector<12x32xbf16>, vector<32x32xbf16>, vector<12x32xf32> -> vector<12x32xf32>
    %20 = vector.broadcast %10 : vector<1x32xf32> to vector<12x32xf32>
    %21 = arith.addf %19, %20 : vector<12x32xf32>
    %cst_27 = arith.constant 0.353553385 : f32
    %22 = vector.broadcast %cst_27 : f32 to vector<12x32xf32>
    %23 = arith.mulf %21, %22 : vector<12x32xf32>
    %cst_28 = arith.constant dense<0.000000e+00> : vector<12x32xf32>
    %24 = tpu.matmul %18, %8, %cst_28 {dimension_numbers = #tpu.dot_dimension_numbers<[1], [0], [0], [1], [0, 0, 1, 1], [], []>} : vector<12x32xbf16>, vector<32x32xbf16>, vector<12x32xf32> -> vector<12x32xf32>
    %25 = vector.broadcast %11 : vector<1x32xf32> to vector<12x32xf32>
    %26 = arith.addf %24, %25 : vector<12x32xf32>
    %cst_29 = arith.constant dense<0.000000e+00> : vector<12x32xf32>
    %27 = tpu.matmul %18, %9, %cst_29 {dimension_numbers = #tpu.dot_dimension_numbers<[1], [0], [0], [1], [0, 0, 1, 1], [], []>} : vector<12x32xbf16>, vector<32x32xbf16>, vector<12x32xf32> -> vector<12x32xf32>
    %28 = vector.broadcast %12 : vector<1x32xf32> to vector<12x32xf32>
    %29 = arith.addf %27, %28 : vector<12x32xf32>
    %30 = vector.extract_strided_slice %23 {offsets = [0, 0], sizes = [12, 8], strides = [1, 1]} : vector<12x32xf32> to vector<12x8xf32>
    %31 = arith.truncf %30 : vector<12x8xf32> to vector<12x8xbf16>
    %32 = vector.extract_strided_slice %26 {offsets = [0, 0], sizes = [12, 8], strides = [1, 1]} : vector<12x32xf32> to vector<12x8xf32>
    %33 = arith.truncf %32 : vector<12x8xf32> to vector<12x8xbf16>
    %34 = vector.extract_strided_slice %29 {offsets = [0, 0], sizes = [12, 8], strides = [1, 1]} : vector<12x32xf32> to vector<12x8xf32>
    %35 = arith.truncf %34 : vector<12x8xf32> to vector<12x8xbf16>
    %cst_30 = arith.constant dense<0.000000e+00> : vector<12x12xf32>
    %36 = tpu.matmul %31, %33, %cst_30 {dimension_numbers = #tpu.dot_dimension_numbers<[1], [1], [0], [0], [0, 0, 1, 0], [], []>} : vector<12x8xbf16>, vector<12x8xbf16>, vector<12x12xf32> -> vector<12x12xf32>
    %37 = arith.addf %36, %6 : vector<12x12xf32>
    %cst_31 = arith.constant dense<0xFF800000> : vector<12xf32>
    %38 = vector.multi_reduction <maximumf>, %37, %cst_31 [1] : vector<12x12xf32> to vector<12xf32>
    %39 = vector.shape_cast %38 : vector<12xf32> to vector<12x1xf32>
    %40 = vector.broadcast %39 : vector<12x1xf32> to vector<12x12xf32>
    %41 = arith.subf %37, %40 : vector<12x12xf32>
    %42 = math.exp %41 : vector<12x12xf32>
    %cst_32 = arith.constant dense<0.000000e+00> : vector<12xf32>
    %43 = vector.multi_reduction <add>, %42, %cst_32 [1] : vector<12x12xf32> to vector<12xf32>
    %44 = vector.shape_cast %43 : vector<12xf32> to vector<12x1xf32>
    %45 = tpu.reciprocal %44 {approx = true} : vector<12x1xf32> -> vector<12x1xf32>
    %46 = vector.broadcast %45 : vector<12x1xf32> to vector<12x12xf32>
    %47 = arith.mulf %42, %46 : vector<12x12xf32>
    %48 = arith.truncf %47 : vector<12x12xf32> to vector<12x12xbf16>
    %cst_33 = arith.constant dense<0.000000e+00> : vector<12x8xf32>
    %49 = tpu.matmul %48, %35, %cst_33 {dimension_numbers = #tpu.dot_dimension_numbers<[1], [0], [0], [1], [0, 0, 1, 1], [], []>} : vector<12x12xbf16>, vector<12x8xbf16>, vector<12x8xf32> -> vector<12x8xf32>
    %50 = vector.extract_strided_slice %23 {offsets = [0, 8], sizes = [12, 8], strides = [1, 1]} : vector<12x32xf32> to vector<12x8xf32>
    %51 = arith.truncf %50 : vector<12x8xf32> to vector<12x8xbf16>
    %52 = vector.extract_strided_slice %26 {offsets = [0, 8], sizes = [12, 8], strides = [1, 1]} : vector<12x32xf32> to vector<12x8xf32>
    %53 = arith.truncf %52 : vector<12x8xf32> to vector<12x8xbf16>
    %54 = vector.extract_strided_slice %29 {offsets = [0, 8], sizes = [12, 8], strides = [1, 1]} : vector<12x32xf32> to vector<12x8xf32>
    %55 = arith.truncf %54 : vector<12x8xf32> to vector<12x8xbf16>
    %cst_34 = arith.constant dense<0.000000e+00> : vector<12x12xf32>
    %56 = tpu.matmul %51, %53, %cst_34 {dimension_numbers = #tpu.dot_dimension_numbers<[1], [1], [0], [0], [0, 0, 1, 0], [], []>} : vector<12x8xbf16>, vector<12x8xbf16>, vector<12x12xf32> -> vector<12x12xf32>
    %57 = arith.addf %56, %6 : vector<12x12xf32>
    %cst_35 = arith.constant dense<0xFF800000> : vector<12xf32>
    %58 = vector.multi_reduction <maximumf>, %57, %cst_35 [1] : vector<12x12xf32> to vector<12xf32>
    %59 = vector.shape_cast %58 : vector<12xf32> to vector<12x1xf32>
    %60 = vector.broadcast %59 : vector<12x1xf32> to vector<12x12xf32>
    %61 = arith.subf %57, %60 : vector<12x12xf32>
    %62 = math.exp %61 : vector<12x12xf32>
    %cst_36 = arith.constant dense<0.000000e+00> : vector<12xf32>
    %63 = vector.multi_reduction <add>, %62, %cst_36 [1] : vector<12x12xf32> to vector<12xf32>
    %64 = vector.shape_cast %63 : vector<12xf32> to vector<12x1xf32>
    %65 = tpu.reciprocal %64 {approx = true} : vector<12x1xf32> -> vector<12x1xf32>
    %66 = vector.broadcast %65 : vector<12x1xf32> to vector<12x12xf32>
    %67 = arith.mulf %62, %66 : vector<12x12xf32>
    %68 = arith.truncf %67 : vector<12x12xf32> to vector<12x12xbf16>
    %cst_37 = arith.constant dense<0.000000e+00> : vector<12x8xf32>
    %69 = tpu.matmul %68, %55, %cst_37 {dimension_numbers = #tpu.dot_dimension_numbers<[1], [0], [0], [1], [0, 0, 1, 1], [], []>} : vector<12x12xbf16>, vector<12x8xbf16>, vector<12x8xf32> -> vector<12x8xf32>
    %70 = vector.extract_strided_slice %23 {offsets = [0, 16], sizes = [12, 8], strides = [1, 1]} : vector<12x32xf32> to vector<12x8xf32>
    %71 = arith.truncf %70 : vector<12x8xf32> to vector<12x8xbf16>
    %72 = vector.extract_strided_slice %26 {offsets = [0, 16], sizes = [12, 8], strides = [1, 1]} : vector<12x32xf32> to vector<12x8xf32>
    %73 = arith.truncf %72 : vector<12x8xf32> to vector<12x8xbf16>
    %74 = vector.extract_strided_slice %29 {offsets = [0, 16], sizes = [12, 8], strides = [1, 1]} : vector<12x32xf32> to vector<12x8xf32>
    %75 = arith.truncf %74 : vector<12x8xf32> to vector<12x8xbf16>
    %cst_38 = arith.constant dense<0.000000e+00> : vector<12x12xf32>
    %76 = tpu.matmul %71, %73, %cst_38 {dimension_numbers = #tpu.dot_dimension_numbers<[1], [1], [0], [0], [0, 0, 1, 0], [], []>} : vector<12x8xbf16>, vector<12x8xbf16>, vector<12x12xf32> -> vector<12x12xf32>
    %77 = arith.addf %76, %6 : vector<12x12xf32>
    %cst_39 = arith.constant dense<0xFF800000> : vector<12xf32>
    %78 = vector.multi_reduction <maximumf>, %77, %cst_39 [1] : vector<12x12xf32> to vector<12xf32>
    %79 = vector.shape_cast %78 : vector<12xf32> to vector<12x1xf32>
    %80 = vector.broadcast %79 : vector<12x1xf32> to vector<12x12xf32>
    %81 = arith.subf %77, %80 : vector<12x12xf32>
    %82 = math.exp %81 : vector<12x12xf32>
    %cst_40 = arith.constant dense<0.000000e+00> : vector<12xf32>
    %83 = vector.multi_reduction <add>, %82, %cst_40 [1] : vector<12x12xf32> to vector<12xf32>
    %84 = vector.shape_cast %83 : vector<12xf32> to vector<12x1xf32>
    %85 = tpu.reciprocal %84 {approx = true} : vector<12x1xf32> -> vector<12x1xf32>
    %86 = vector.broadcast %85 : vector<12x1xf32> to vector<12x12xf32>
    %87 = arith.mulf %82, %86 : vector<12x12xf32>
    %88 = arith.truncf %87 : vector<12x12xf32> to vector<12x12xbf16>
    %cst_41 = arith.constant dense<0.000000e+00> : vector<12x8xf32>
    %89 = tpu.matmul %88, %75, %cst_41 {dimension_numbers = #tpu.dot_dimension_numbers<[1], [0], [0], [1], [0, 0, 1, 1], [], []>} : vector<12x12xbf16>, vector<12x8xbf16>, vector<12x8xf32> -> vector<12x8xf32>
    %90 = vector.extract_strided_slice %23 {offsets = [0, 24], sizes = [12, 8], strides = [1, 1]} : vector<12x32xf32> to vector<12x8xf32>
    %91 = arith.truncf %90 : vector<12x8xf32> to vector<12x8xbf16>
    %92 = vector.extract_strided_slice %26 {offsets = [0, 24], sizes = [12, 8], strides = [1, 1]} : vector<12x32xf32> to vector<12x8xf32>
    %93 = arith.truncf %92 : vector<12x8xf32> to vector<12x8xbf16>
    %94 = vector.extract_strided_slice %29 {offsets = [0, 24], sizes = [12, 8], strides = [1, 1]} : vector<12x32xf32> to vector<12x8xf32>
    %95 = arith.truncf %94 : vector<12x8xf32> to vector<12x8xbf16>
    %cst_42 = arith.constant dense<0.000000e+00> : vector<12x12xf32>
    %96 = tpu.matmul %91, %93, %cst_42 {dimension_numbers = #tpu.dot_dimension_numbers<[1], [1], [0], [0], [0, 0, 1, 0], [], []>} : vector<12x8xbf16>, vector<12x8xbf16>, vector<12x12xf32> -> vector<12x12xf32>
    %97 = arith.addf %96, %6 : vector<12x12xf32>
    %cst_43 = arith.constant dense<0xFF800000> : vector<12xf32>
    %98 = vector.multi_reduction <maximumf>, %97, %cst_43 [1] : vector<12x12xf32> to vector<12xf32>
    %99 = vector.shape_cast %98 : vector<12xf32> to vector<12x1xf32>
    %100 = vector.broadcast %99 : vector<12x1xf32> to vector<12x12xf32>
    %101 = arith.subf %97, %100 : vector<12x12xf32>
    %102 = math.exp %101 : vector<12x12xf32>
    %cst_44 = arith.constant dense<0.000000e+00> : vector<12xf32>
    %103 = vector.multi_reduction <add>, %102, %cst_44 [1] : vector<12x12xf32> to vector<12xf32>
    %104 = vector.shape_cast %103 : vector<12xf32> to vector<12x1xf32>
    %105 = tpu.reciprocal %104 {approx = true} : vector<12x1xf32> -> vector<12x1xf32>
    %106 = vector.broadcast %105 : vector<12x1xf32> to vector<12x12xf32>
    %107 = arith.mulf %102, %106 : vector<12x12xf32>
    %108 = arith.truncf %107 : vector<12x12xf32> to vector<12x12xbf16>
    %cst_45 = arith.constant dense<0.000000e+00> : vector<12x8xf32>
    %109 = tpu.matmul %108, %95, %cst_45 {dimension_numbers = #tpu.dot_dimension_numbers<[1], [0], [0], [1], [0, 0, 1, 1], [], []>} : vector<12x12xbf16>, vector<12x8xbf16>, vector<12x8xf32> -> vector<12x8xf32>
    %110 = tpu.concatenate %49, %69, %89, %109 in 1 : vector<12x8xf32>, vector<12x8xf32>, vector<12x8xf32>, vector<12x8xf32> -> vector<12x32xf32>
    %111 = arith.truncf %110 : vector<12x32xf32> to vector<12x32xbf16>
    %cst_46 = arith.constant dense<0.000000e+00> : vector<12x32xf32>
    %112 = tpu.matmul %111, %13, %cst_46 {dimension_numbers = #tpu.dot_dimension_numbers<[1], [0], [0], [1], [0, 0, 1, 1], [], []>} : vector<12x32xbf16>, vector<32x32xbf16>, vector<12x32xf32> -> vector<12x32xf32>
    %113 = vector.broadcast %14 : vector<1x32xf32> to vector<12x32xf32>
    %114 = arith.addf %112, %113 : vector<12x32xf32>
    %115 = arith.addf %1, %114 : vector<12x32xf32>
    %cst_47 = arith.constant dense<0.000000e+00> : vector<12xf32>
    %116 = vector.multi_reduction <add>, %115, %cst_47 [1] : vector<12x32xf32> to vector<12xf32>
    %117 = vector.shape_cast %116 : vector<12xf32> to vector<12x1xf32>
    %cst_48 = arith.constant 3.200000e+01 : f32
    %118 = vector.broadcast %cst_48 : f32 to vector<12x1xf32>
    %119 = arith.divf %117, %118 : vector<12x1xf32>
    %120 = vector.broadcast %119 : vector<12x1xf32> to vector<12x32xf32>
    %121 = arith.subf %115, %120 : vector<12x32xf32>
    %122 = arith.mulf %121, %121 : vector<12x32xf32>
    %cst_49 = arith.constant dense<0.000000e+00> : vector<12xf32>
    %123 = vector.multi_reduction <add>, %122, %cst_49 [1] : vector<12x32xf32> to vector<12xf32>
    %124 = vector.shape_cast %123 : vector<12xf32> to vector<12x1xf32>
    %cst_50 = arith.constant 3.200000e+01 : f32
    %125 = vector.broadcast %cst_50 : f32 to vector<12x1xf32>
    %126 = arith.divf %124, %125 : vector<12x1xf32>
    %127 = vector.broadcast %119 : vector<12x1xf32> to vector<12x32xf32>
    %128 = arith.subf %115, %127 : vector<12x32xf32>
    %cst_51 = arith.constant 9.99999974E-6 : f32
    %129 = vector.broadcast %cst_51 : f32 to vector<12x1xf32>
    %130 = arith.addf %126, %129 : vector<12x1xf32>
    %131 = math.rsqrt %130 : vector<12x1xf32>
    %132 = vector.broadcast %131 : vector<12x1xf32> to vector<12x32xf32>
    %133 = arith.mulf %128, %132 : vector<12x32xf32>
    %134 = vector.broadcast %15 : vector<1x32xf32> to vector<12x32xf32>
    %135 = arith.mulf %133, %134 : vector<12x32xf32>
    %136 = vector.broadcast %16 : vector<1x32xf32> to vector<12x32xf32>
    %137 = arith.addf %135, %136 : vector<12x32xf32>
    %c0_52 = arith.constant 0 : index
    %c0_53 = arith.constant 0 : index
    %c0_54 = arith.constant 0 : index
    %138 = vector.load %arg15[%c0_52, %c0_53, %c0_54] : memref<1x12x32xf32, #tpu.memory_space<vmem>>, vector<1x12x32xf32>
    %139 = vector.shape_cast %138 : vector<1x12x32xf32> to vector<12x32xf32>
    %140 = vector.shape_cast %137 : vector<12x32xf32> to vector<1x12x32xf32>
    tpu.vector_store %arg15[%c0_52, %c0_53, %c0_54], %140 {strides = array<i32>} : memref<1x12x32xf32, #tpu.memory_space<vmem>>, vector<1x12x32xf32>,
    return
  }
  func.func @transform_0(%arg0: i32, %arg1: i32) -> (i32, i32, i32) {
    %c0_i32 = arith.constant 0 : i32
    %c0_i32_0 = arith.constant 0 : i32
    %c0_i32_1 = arith.constant 0 : i32
    return %arg0, %c0_i32, %c0_i32_0 : i32, i32, i32
  }
  func.func @transform_1(%arg0: i32, %arg1: i32) -> (i32, i32) {
    %c0_i32 = arith.constant 0 : i32
    %c0_i32_0 = arith.constant 0 : i32
    return %arg1, %c0_i32 : i32, i32
  }
  func.func @transform_2(%arg0: i32, %arg1: i32) -> (i32, i32, i32) {
    %c0_i32 = arith.constant 0 : i32
    %c0_i32_0 = arith.constant 0 : i32
    %c0_i32_1 = arith.constant 0 : i32
    return %arg0, %c0_i32, %c0_i32_0 : i32, i32, i32
  }
  func.func @transform_3(%arg0: i32, %arg1: i32) -> (i32, i32) {
    %c0_i32 = arith.constant 0 : i32
    %c0_i32_0 = arith.constant 0 : i32
    %c0_i32_1 = arith.constant 0 : i32
    return %c0_i32, %c0_i32_0 : i32, i32
  }
  func.func @transform_4(%arg0: i32, %arg1: i32) -> (i32, i32) {
    %c0_i32 = arith.constant 0 : i32
    %c0_i32_0 = arith.constant 0 : i32
    %c0_i32_1 = arith.constant 0 : i32
    return %c0_i32, %c0_i32_0 : i32, i32
  }
  func.func @transform_5(%arg0: i32, %arg1: i32) -> (i32, i32) {
    %c0_i32 = arith.constant 0 : i32
    %c0_i32_0 = arith.constant 0 : i32
    %c0_i32_1 = arith.constant 0 : i32
    return %c0_i32, %c0_i32_0 : i32, i32
  }
  func.func @transform_6(%arg0: i32, %arg1: i32) -> (i32, i32) {
    %c0_i32 = arith.constant 0 : i32
    %c0_i32_0 = arith.constant 0 : i32
    %c0_i32_1 = arith.constant 0 : i32
    return %c0_i32, %c0_i32_0 : i32, i32
  }
  func.func @transform_7(%arg0: i32, %arg1: i32) -> (i32, i32) {
    %c0_i32 = arith.constant 0 : i32
    %c0_i32_0 = arith.constant 0 : i32
    %c0_i32_1 = arith.constant 0 : i32
    return %c0_i32, %c0_i32_0 : i32, i32
  }
  func.func @transform_8(%arg0: i32, %arg1: i32) -> (i32, i32) {
    %c0_i32 = arith.constant 0 : i32
    %c0_i32_0 = arith.constant 0 : i32
    %c0_i32_1 = arith.constant 0 : i32
    return %c0_i32, %c0_i32_0 : i32, i32
  }
  func.func @transform_9(%arg0: i32, %arg1: i32) -> (i32, i32) {
    %c0_i32 = arith.constant 0 : i32
    %c0_i32_0 = arith.constant 0 : i32
    %c0_i32_1 = arith.constant 0 : i32
    return %c0_i32, %c0_i32_0 : i32, i32
  }
  func.func @transform_10(%arg0: i32, %arg1: i32) -> (i32, i32) {
    %c0_i32 = arith.constant 0 : i32
    %c0_i32_0 = arith.constant 0 : i32
    %c0_i32_1 = arith.constant 0 : i32
    return %c0_i32, %c0_i32_0 : i32, i32
  }
  func.func @transform_11(%arg0: i32, %arg1: i32) -> (i32, i32) {
    %c0_i32 = arith.constant 0 : i32
    %c0_i32_0 = arith.constant 0 : i32
    %c0_i32_1 = arith.constant 0 : i32
    return %c0_i32, %c0_i32_0 : i32, i32
  }
  func.func @transform_12(%arg0: i32, %arg1: i32) -> (i32, i32) {
    %c0_i32 = arith.constant 0 : i32
    %c0_i32_0 = arith.constant 0 : i32
    %c0_i32_1 = arith.constant 0 : i32
    return %c0_i32, %c0_i32_0 : i32, i32
  }
  func.func @transform_13(%arg0: i32, %arg1: i32) -> (i32, i32, i32) {
    %c0_i32 = arith.constant 0 : i32
    %c0_i32_0 = arith.constant 0 : i32
    return %arg0, %arg1, %c0_i32 : i32, i32, i32
  }
}

</mosaic_0001>

<bundles_post_ra>
// kernel: tpu_custom_call.1
= control target key start
LH: loop header
LB: loop body
LE: loop exit
PB: predicated region body
PF: predicated region fallthrough
CT: control target
= control target key end

     0   :  { %s3352_s0 = inlined_call_operand.hbm [shape: f32[2,12,32], index: 0, kind: input, shape index: {}]   ;;  %s3353_s1 = inlined_call_operand.hbm [shape: f32[12,12], index: 1, kind: input, shape index: {}]   ;;  %s3354_s2 = inlined_call_operand.hbm [shape: f32[2,1,12], index: 2, kind: input, shape index: {}]   ;;  %s3355_s3 = inlined_call_operand.hbm [shape: bf16[32,32], index: 3, kind: input, shape index: {}]   ;;  %s3356_s4 = inlined_call_operand.hbm [shape: bf16[32,32], index: 4, kind: input, shape index: {}]   ;;  %s3357_s5 = inlined_call_operand.hbm [shape: bf16[32,32], index: 5, kind: input, shape index: {}]   ;;  %s3358_s6 = inlined_call_operand.hbm [shape: f32[1,32], index: 6, kind: input, shape index: {}]   ;;  %s3359_s7 = inlined_call_operand.hbm [shape: f32[1,32], index: 7, kind: input, shape index: {}]   ;;  %s3360_s8 = inlined_call_operand.hbm [shape: f32[1,32], index: 8, kind: input, shape index: {}]   ;;  %s3361_s9 = inlined_call_operand.hbm [shape: bf16[32,32], index: 9, kind: input, shape index: {}]   ;;  %s3362_s10 = inlined_call_operand.hbm [shape: f32[1,32], index: 10, kind: input, shape index: {}]   ;;  %s3363_s11 = inlined_call_operand.hbm [shape: f32[1,32], index: 11, kind: input, shape index: {}]   ;;  %s3364_s12 = inlined_call_operand.hbm [shape: f32[1,32], index: 12, kind: input, shape index: {}]   ;;  %s3365_s13 = inlined_call_operand.hbm [shape: f32[2,12,32], index: 13, kind: output, shape index: {}]  }
   0x1   :  { %3390 = sst [smem:[#allocation37_spill]] %s3352_s0 }
   0x2   :  { %3391 = sst [smem:[#allocation38_spill]] %s3353_s1 }
   0x3   :  { %3392 = sst [smem:[#allocation39_spill]] %s3354_s2 }
   0x4   :  { %3393 = sst [smem:[#allocation40_spill]] %s3355_s3 }
   0x5   :  { %3394 = sst [smem:[#allocation41_spill]] %s3356_s4 }
   0x6   :  { %3395 = sst [smem:[#allocation42_spill]] %s3357_s5 }
   0x7   :  { %3396 = sst [smem:[#allocation43_spill]] %s3358_s6 }
   0x8   :  { %3397 = sst [smem:[#allocation44_spill]] %s3359_s7 }
   0x9   :  { %3398 = sst [smem:[#allocation45_spill]] %s3360_s8 }
   0xa   :  { %3399 = sst [smem:[#allocation46_spill]] %s3361_s9 }
   0xb   :  { %3400 = sst [smem:[#allocation47_spill]] %s3362_s10 }
   0xc   :  { %3401 = sst [smem:[#allocation48_spill]] %s3363_s11 }
   0xd   :  { %3402 = sst [smem:[#allocation49_spill]] %s3364_s12 }
   0xe   :  { %3403 = sst [smem:[#allocation50_spill]] %s3365_s13 }
   0xf   :  { %18 = vsyncpa [#allocation3], 0 }
  0x10   :  { %20 = vsyncpa [#allocation3 + $0x1], 0 }
  0x11   :  { %21 = vsyncpa [#allocation6], 0 }
  0x12   :  { %22 = vsyncpa [#allocation10], 0 }
  0x13   :  { %23 = vsyncpa [#allocation13], 0 }
  0x14   :  { %24 = vsyncpa [#allocation16], 0 }
  0x15   :  { %25 = vsyncpa [#allocation19], 0 }
  0x16   :  { %26 = vsyncpa [#allocation22], 0 }
  0x17   :  { %27 = vsyncpa [#allocation4], 0 }
  0x18   :  { %29 = vsyncpa [#allocation4 + $0x1], 0  ;;  %s2751_s25 = smov 0   ;;  %s2753_s26 = smov 0  }
  0x19   :  { %s2755_s27 = smov 0   ;;  %s2757_s28 = smov 0  }
  0x1a   :  { %s2759_s29 = smov 0   ;;  %s2761_s30 = smov 0  }
  0x1b LB: > { %3404 = sst [smem:[#allocation34_spill]] %s2644_s28  ;;  %s2782_s14 = sadd.s32 4294967295, %s2652_s30   ;;  %s2652_s30 = sphi %s2761_s30, %s35_s30   ;;  %s2648_s29 = sphi %s2759_s29, %s3465_s29   ;;  %s2644_s28 = sphi %s2757_s28, %s3464_s28   ;;  %s2640_s27 = sphi %s2755_s27, %s3463_s27   ;;  %s2636_s26 = sphi %s2753_s26, %s3462_s26   ;;  %s2632_s25 = sphi %s2751_s25, %s3461_s25  }
  0x1c   : > { %p1747_p0 = scmp.ge.s32.totalorder %s2652_s30, 1  ;;  %p3368_p1 = scmp.eq.s32.totalorder %s2782_s14, 0 }
  0x1d   : > { %p368_p2 = scmp.lt.s32.totalorder %s2652_s30, 3  ;;  %s2654_s16 = smov [#allocation5]  }
  0x1e   : > { %s383_s17 = sshll.u32 %s2654_s16, 4  ;;  %s2655_s19 = smov [#allocation9]   ;;  %s384_s17 = int_to_ptr.vmem [resolvable:$true] %s383_s17 }
  0x1f   : > { %p2787_p3 = pnand %p1747_p0, %p368_p2  ;;  %s409_s20 = sshll.u32 %s2655_s19, 4  ;;  %s410_s20 = int_to_ptr.vmem [resolvable:$true] %s409_s20 }
  0x20   : > { %s3408_s1 = sld [smem:[#allocation38_spill]] }
  0x21   : > { %s3405_s15 = scalar_select %p2787_p3, 1, 0 }
  0x22   : > { %p1970_p4 = pneg %p2787_p3 }
  0x23   : > { %3406 = sst [smem:[#allocation35_spill]] %s3405_s15 }
  0x24   : > { %p2796_p6 = pnand %p1970_p4, %p3368_p1 }
  0x26   : > { %s3407_s18 = scalar_select %p2796_p6, 1, 0 }
  0x27   : > { %s2170_s23 = scalar_lea.hbm %s3408_s1, 256  ;;  %p2808_p8 = pneg %p2796_p6 }
  0x28   : > { %p2171_p7 = scmp.ne.s32.totalorder %s3408_s1, %s2170_s23  ;;  %p2177_p11 = scmp.lt.u32.totalorder %s2170_s23, %s3408_s1 }
  0x2a   : > { %p2173_p9 = pnand %p2808_p8, %p2171_p7 }
  0x2c   : > { %p2174_p10 = pneg %p2173_p9 }
  0x2e   : > { %p2179_p12 = pnand %p2177_p11, %p2174_p10 }
  0x30   : > { %2182 = shalt.err (!%p2179_p12)
}
  0x31   : > { %s2183_s19 = scalar_lea.vmem %s384_s17, 256  ;;  %p2191_p4 = scmp.lt.s32.totalorder %s384_s17, %s384_s17 }
  0x32   : > { %p2184_p13 = scmp.ne.s32.totalorder %s384_s17, %s2183_s19  ;;  %p2192_p5 = scmp.lt.s32.totalorder %s2183_s19, %s2183_s19 }
  0x34   : > { %p2186_p0 = pnand %p2184_p13, %p2808_p8  ;;  %p2193_p1 = por %p2192_p5, %p2191_p4 }
  0x36   : > { %p2187_p2 = pneg %p2186_p0 }
  0x38   : > { %p2194_p3 = pnand %p2193_p1, %p2187_p2 }
  0x3a   : > { %2197 = shalt.err (!%p2194_p3)
}
  0x3b   : > { %s3379_s13 = smov 128   ;;  %s3380_s21 = smov 8  }
  0x3c   : > { %1973 = dma.hbm_to_vmem [thread:$0]  (!%p2796_p6), %s3408_s1, 256, %s384_s17, [#allocation6], %s3379_s13, %s3379_s13, %s3380_s21  }
  0x3d   : > { %s2658_s22 = smov [#allocation12]   ;;  %s3410_s4 = sld [smem:[#allocation41_spill]] }
  0x3e   : > { %s436_s23 = sshll.u32 %s2658_s22, 4  ;;  %s437_s23 = int_to_ptr.vmem [resolvable:$true] %s436_s23 }
  0x43   : > { %s2198_s2 = scalar_lea.hbm %s3410_s4, 256 }
  0x44   : > { %p2199_p1 = scmp.ne.s32.totalorder %s3410_s4, %s2198_s2  ;;  %p2205_p7 = scmp.lt.u32.totalorder %s2198_s2, %s3410_s4 }
  0x46   : > { %p2201_p3 = pnand %p2199_p1, %p2808_p8 }
  0x48   : > { %p2202_p5 = pneg %p2201_p3 }
  0x4a   : > { %p2207_p9 = pnand %p2205_p7, %p2202_p5 }
  0x4c   : > { %2210 = shalt.err (!%p2207_p9)
}
  0x4d   : > { %s2211_s17 = scalar_lea.vmem %s410_s20, 256  ;;  %p2219_p13 = scmp.lt.s32.totalorder %s410_s20, %s410_s20 }
  0x4e   : > { %p2212_p10 = scmp.ne.s32.totalorder %s410_s20, %s2211_s17  ;;  %p2220_p0 = scmp.lt.s32.totalorder %s2211_s17, %s2211_s17 }
  0x50   : > { %p2214_p11 = pnand %p2212_p10, %p2808_p8  ;;  %p2221_p2 = por %p2220_p0, %p2219_p13 }
  0x52   : > { %p2215_p12 = pneg %p2214_p11 }
  0x54   : > { %p2222_p4 = pnand %p2221_p2, %p2215_p12 }
  0x56   : > { %2225 = shalt.err (!%p2222_p4)
}
  0x57   : > { %s3375_s11 = smov 64   ;;  %s3377_s12 = smov 4  }
  0x58   : > { %1979 = dma.hbm_to_vmem [thread:$0]  (!%p2796_p6), %s3410_s4, 256, %s410_s20, [#allocation10], %s3375_s11, %s3375_s11, %s3377_s12  }
  0x59   : > { %s3411_s6 = sld [smem:[#allocation43_spill]] }
  0x5f   : > { %s2226_s15 = scalar_lea.hbm %s3411_s6, 16 }
  0x60   : > { %p2227_p1 = scmp.ne.s32.totalorder %s3411_s6, %s2226_s15  ;;  %p2233_p7 = scmp.lt.u32.totalorder %s2226_s15, %s3411_s6 }
  0x62   : > { %p2229_p3 = pnand %p2227_p1, %p2808_p8 }
  0x64   : > { %p2230_p5 = pneg %p2229_p3 }
  0x66   : > { %p2235_p9 = pnand %p2233_p7, %p2230_p5 }
  0x68   : > { %2238 = shalt.err (!%p2235_p9)
}
  0x69   : > { %s2239_s2 = scalar_lea.vmem %s437_s23, 16  ;;  %s2246_s20 = scalar_lea.vmem %s437_s23, 32 }
  0x6a   : > { %p2240_p10 = scmp.ne.s32.totalorder %s437_s23, %s2239_s2  ;;  %p2247_p13 = scmp.lt.s32.totalorder %s437_s23, %s437_s23 }
  0x6b   : > { %p2248_p0 = scmp.lt.s32.totalorder %s2246_s20, %s2239_s2 }
  0x6c   : > { %p2242_p11 = pnand %p2240_p10, %p2808_p8 }
  0x6d   : > { %p2249_p2 = por %p2248_p0, %p2247_p13 }
  0x6e   : > { %p2243_p12 = pneg %p2242_p11 }
  0x70   : > { %p2250_p4 = pnand %p2249_p2, %p2243_p12 }
  0x72   : > { %2253 = shalt.err (!%p2250_p4)
}
  0x73   : > { %1985 = dma.hbm_to_vmem [thread:$0]  (!%p2796_p6), %s3411_s6, 16, %s437_s23, [#allocation13]  }
  0x74   : > { %s2661_s28 = smov [#allocation15]   ;;  %s2662_s22 = smov [#allocation18]  }
  0x75   : > { %s458_s15 = sshll.u32 %s2661_s28, 4  ;;  %s482_s24 = sshll.u32 %s2662_s22, 4  ;;  %s459_s15 = int_to_ptr.vmem [resolvable:$true] %s458_s15  ;;  %s483_s24 = int_to_ptr.vmem [resolvable:$true] %s482_s24 }
  0x76   : > { %s3412_s8 = sld [smem:[#allocation45_spill]] }
  0x7c   : > { %s2254_s11 = scalar_lea.hbm %s3412_s8, 16 }
  0x7d   : > { %p2255_p1 = scmp.ne.s32.totalorder %s3412_s8, %s2254_s11  ;;  %p2261_p7 = scmp.lt.u32.totalorder %s2254_s11, %s3412_s8 }
  0x7f   : > { %p2257_p3 = pnand %p2255_p1, %p2808_p8 }
  0x81   : > { %p2258_p5 = pneg %p2257_p3 }
  0x83   : > { %p2263_p9 = pnand %p2261_p7, %p2258_p5 }
  0x85   : > { %2266 = shalt.err (!%p2263_p9)
}
  0x86   : > { %s2267_s23 = scalar_lea.vmem %s459_s15, 16  ;;  %s2274_s9 = scalar_lea.vmem %s459_s15, 32 }
  0x87   : > { %p2268_p10 = scmp.ne.s32.totalorder %s459_s15, %s2267_s23  ;;  %p2275_p13 = scmp.lt.s32.totalorder %s459_s15, %s459_s15 }
  0x88   : > { %p2276_p0 = scmp.lt.s32.totalorder %s2274_s9, %s2267_s23 }
  0x89   : > { %p2270_p11 = pnand %p2268_p10, %p2808_p8 }
  0x8a   : > { %p2277_p2 = por %p2276_p0, %p2275_p13 }
  0x8b   : > { %p2271_p12 = pneg %p2270_p11 }
  0x8d   : > { %p2278_p4 = pnand %p2277_p2, %p2271_p12 }
  0x8f   : > { %2281 = shalt.err (!%p2278_p4)
}
  0x90   : > { %1991 = dma.hbm_to_vmem [thread:$0]  (!%p2796_p6), %s3412_s8, 16, %s459_s15, [#allocation16]  }
  0x91   : > { %s3413_s10 = sld [smem:[#allocation47_spill]] }
  0x97   : > { %s2282_s19 = scalar_lea.hbm %s3413_s10, 16 }
  0x98   : > { %p2283_p1 = scmp.ne.s32.totalorder %s3413_s10, %s2282_s19  ;;  %p2289_p7 = scmp.lt.u32.totalorder %s2282_s19, %s3413_s10 }
  0x9a   : > { %p2285_p3 = pnand %p2283_p1, %p2808_p8 }
  0x9c   : > { %p2286_p5 = pneg %p2285_p3 }
  0x9e   : > { %p2291_p9 = pnand %p2289_p7, %p2286_p5 }
  0xa0   : > { %2294 = shalt.err (!%p2291_p9)
}
  0xa1   : > { %s2295_s23 = scalar_lea.vmem %s483_s24, 16  ;;  %s2302_s15 = scalar_lea.vmem %s483_s24, 32 }
  0xa2   : > { %p2296_p10 = scmp.ne.s32.totalorder %s483_s24, %s2295_s23  ;;  %p2303_p13 = scmp.lt.s32.totalorder %s483_s24, %s483_s24 }
  0xa3   : > { %p2304_p0 = scmp.lt.s32.totalorder %s2302_s15, %s2295_s23 }
  0xa4   : > { %p2298_p11 = pnand %p2296_p10, %p2808_p8 }
  0xa5   : > { %p2305_p2 = por %p2304_p0, %p2303_p13 }
  0xa6   : > { %p2299_p12 = pneg %p2298_p11 }
  0xa8   : > { %p2306_p4 = pnand %p2305_p2, %p2299_p12 }
  0xaa   : > { %2309 = shalt.err (!%p2306_p4)
}
  0xab   : > { %1997 = dma.hbm_to_vmem [thread:$0]  (!%p2796_p6), %s3413_s10, 16, %s483_s24, [#allocation19]  }
  0xac   : > { %s1746_s22 = sadd.s32 4294967294, %s2652_s30   ;;  %s47_s11 = sadd.s32 1, %s2648_s29 }
  0xad   : > { %s54_s12 = sadd.s32 1, %s2640_s27  ;;  %p49_p1 = scmp.ge.s32.totalorder %s47_s11, 2 }
  0xae   : > { %p61_p3 = scmp.ne.s32.totalorder %s2640_s27, %s2636_s26  ;;  %p62_p5 = scmp.eq.s32.totalorder %s2652_s30, 0 }
  0xaf   : > { %p67_p7 = scmp.ne.s32.totalorder %s2636_s26, %s2632_s25  ;;  %s3467_s11 = smov (%p49_p1, %s47_s11), 0 }
  0xb0   : > { %3414 = sst [smem:[#allocation36_spill]] %s3467_s11  ;;  %p2912_p9 = por %p62_p5, %p61_p3 }
  0xb1   : > { %p3416_p10 = scmp.eq.s32.totalorder %s2782_s14, 0  ;;  %s51_s17 = ssub.s32 %s2648_s29, %s3467_s11 }
  0xb2   : > { %p355_p12 = scmp.eq.s32.totalorder %s2782_s14, 1  ;;  %p52_p13 = scmp.eq.s32.totalorder %s51_s17, 0 }
  0xb3   : > { %p2918_p11 = por %p3416_p10, %p67_p7  ;;  %p361_p0 = scmp.eq.s32.totalorder %s1746_s22, 1 }
  0xb4   : > { %p2925_p2 = por %p355_p12, %p61_p3  ;;  %p2026_p4 = scmp.lt.s32.totalorder %s2652_s30, 2 }
  0xb5   : > { %s3417_s24 = scalar_select %p2918_p11, 1, 0 }
  0xb6   : > { %s3418_s2 = scalar_select %p2925_p2, 1, 0 }
  0xb7   : > { %s2931_s20 = scalar_select %p52_p13, %s2640_s27, %s54_s12  }
  0xb8   : > { %p2933_p1 = por %p361_p0, %p67_p7  ;;  %s515_s23 = sand.u32 1, %s2652_s30  }
  0xb9   : > { %s3381_s15 = sand.u32 1, %s2640_s27   ;;  %s1810_s28 = sshll.u32 %s2648_s29, 8 }
  0xba   : > { %s3419_s7 = scalar_select %p2933_p1, 1, 0 }
  0xbb   : > { %s1760_s9 = sshll.u32 %s3381_s15, 4  ;;  %s3420_s0 = sld [smem:[#allocation37_spill]] }
  0xbc   : > { %s519_s17 = scalar_lea.vmem [#allocation2], %s1760_s9  ;;  %p2949_p3 = pnand %p2026_p4, %p2912_p9 }
  0xbd   : > { %s526_s12 = sshll.u32 %s519_s17, 4  ;;  %s2663_s15 = smov [#allocation8]   ;;  %s2953_s12 = int_to_ptr.vmem [resolvable:$true] %s526_s12 }
  0xbe   : > { %s3421_s1 = scalar_select %p2949_p3, 1, 0 }
  0xbf   : > { %s2955_s4 = sshll.u32 %s2663_s15, 4  ;;  %s2957_s13 = scalar_lea.sflag [#allocation3], %s515_s23  ;;  %s397_s4 = int_to_ptr.vmem [resolvable:$true] %s2955_s4 }
  0xc0   : > { %p3386_p7 = pneg %p2949_p3 }
  0xc1   : > { %s2945_s22 = scalar_lea.hbm %s3420_s0, %s1810_s28  ;;  %s2315_s28 = scalar_lea.hbm %s3420_s0, 512 }
  0xc2   : > { %s2310_s21 = scalar_lea.hbm %s2945_s22, 256  ;;  %p2316_p12 = scmp.lt.u32.totalorder %s2945_s22, %s3420_s0 }
  0xc3   : > { %p2311_p5 = scmp.ne.s32.totalorder %s2945_s22, %s2310_s21  ;;  %p2317_p13 = scmp.lt.u32.totalorder %s2315_s28, %s2310_s21 }
  0xc4   : > { %p2319_p4 = scmp.lt.u32.totalorder %s2310_s21, %s2945_s22 }
  0xc5   : > { %p2313_p10 = pnand %p3386_p7, %p2311_p5  ;;  %p2318_p0 = por %p2317_p13, %p2316_p12 }
  0xc7   : > { %p2314_p9 = pneg %p2313_p10  ;;  %p2320_p1 = por %p2319_p4, %p2318_p0 }
  0xc9   : > { %p2321_p2 = pnand %p2320_p1, %p2314_p9 }
  0xcb   : > { %2324 = shalt.err (!%p2321_p2)
}
  0xcc   : > { %s2325_s23 = scalar_lea.vmem %s2953_s12, 256  ;;  %s2664_s15 = smov [#allocation2]  }
  0xcd   : > { %p2326_p5 = scmp.ne.s32.totalorder %s2953_s12, %s2325_s23  ;;  %s2330_s19 = sshll.u32 %s2664_s15, 4  ;;  %s2331_s19 = int_to_ptr.vmem [resolvable:$false] %s2330_s19 }
  0xce   : > { %s2332_s6 = scalar_lea.vmem %s2331_s19, 512  ;;  %p2333_p6 = scmp.lt.s32.totalorder %s2953_s12, %s2331_s19 }
  0xcf   : > { %p2328_p10 = pnand %p2326_p5, %p3386_p7  ;;  %p2334_p12 = scmp.lt.s32.totalorder %s2332_s6, %s2325_s23 }
  0xd1   : > { %p2329_p11 = pneg %p2328_p10  ;;  %p2335_p13 = por %p2334_p12, %p2333_p6 }
  0xd3   : > { %p2336_p0 = pnand %p2335_p13, %p2329_p11 }
  0xd5   : > { %2339 = shalt.err (!%p2336_p0)
}
  0xd6   : > { %s3422_s21 = smov 8   ;;  %s3423_s9 = smov 128  }
  0xd7   : > { %2007 = dma.hbm_to_vmem [thread:$0]  (!%p2949_p3), %s2945_s22, 256, %s2953_s12, %s2957_s13, %s3423_s9, %s3423_s9, %s3422_s21  }
  0xd8   : > { %s3424_s3 = sld [smem:[#allocation40_spill]] }
  0xde   : > { %s2340_s15 = scalar_lea.hbm %s3424_s3, 256 }
  0xdf   : > { %p2341_p6 = scmp.ne.s32.totalorder %s3424_s3, %s2340_s15  ;;  %p2347_p1 = scmp.lt.u32.totalorder %s2340_s15, %s3424_s3 }
  0xe1   : > { %p2343_p11 = pnand %p2341_p6, %p2808_p8 }
  0xe3   : > { %p2344_p2 = pneg %p2343_p11 }
  0xe5   : > { %p2349_p9 = pnand %p2347_p1, %p2344_p2 }
  0xe7   : > { %2352 = shalt.err (!%p2349_p9)
}
  0xe8   : > { %s2353_s8 = scalar_lea.vmem %s397_s4, 256  ;;  %p2361_p12 = scmp.lt.s32.totalorder %s397_s4, %s397_s4 }
  0xe9   : > { %p2354_p4 = scmp.ne.s32.totalorder %s397_s4, %s2353_s8  ;;  %p2362_p13 = scmp.lt.s32.totalorder %s2353_s8, %s2353_s8 }
  0xeb   : > { %p2356_p5 = pnand %p2354_p4, %p2808_p8  ;;  %p2363_p0 = por %p2362_p13, %p2361_p12 }
  0xed   : > { %p2357_p10 = pneg %p2356_p5 }
  0xef   : > { %p2364_p7 = pnand %p2363_p0, %p2357_p10 }
  0xf1   : > { %2367 = shalt.err (!%p2364_p7)
}
  0xf2   : > { %p3425_p6 = scmp.ne.s32.totalorder %s3407_s18, 0  ;;  %s3426_s22 = smov 4  }
  0xf3   : > { %s3427_s12 = smov 64   ;;  %s2665_s9 = smov [#allocation11]  }
  0xf4   : > { %1976 = dma.hbm_to_vmem [thread:$0]  (!%p3425_p6), %s3424_s3, 256, %s397_s4, [#allocation6], %s3427_s12, %s3427_s12, %s3426_s22  }
  0xf5   : > { %s422_s28 = sshll.u32 %s2665_s9, 4  ;;  %s2666_s17 = smov [#allocation14]   ;;  %s423_s28 = int_to_ptr.vmem [resolvable:$true] %s422_s28 }
  0xf6   : > { %s447_s15 = sshll.u32 %s2666_s17, 4  ;;  %s3428_s5 = sld [smem:[#allocation42_spill]]  ;;  %s448_s15 = int_to_ptr.vmem [resolvable:$true] %s447_s15 }
  0xfc   : > { %s2368_s19 = scalar_lea.hbm %s3428_s5, 256 }
  0xfd   : > { %p2369_p7 = scmp.ne.s32.totalorder %s3428_s5, %s2368_s19  ;;  %p2375_p1 = scmp.lt.u32.totalorder %s2368_s19, %s3428_s5 }
  0xff   : > { %p2371_p11 = pnand %p2369_p7, %p2808_p8 }
 0x101   : > { %p2372_p2 = pneg %p2371_p11 }
 0x103   : > { %p2377_p9 = pnand %p2375_p1, %p2372_p2 }
 0x105   : > { %2380 = shalt.err (!%p2377_p9)
}
 0x106   : > { %s2381_s4 = scalar_lea.vmem %s423_s28, 256  ;;  %p2389_p12 = scmp.lt.s32.totalorder %s423_s28, %s423_s28 }
 0x107   : > { %p2382_p4 = scmp.ne.s32.totalorder %s423_s28, %s2381_s4  ;;  %p2390_p13 = scmp.lt.s32.totalorder %s2381_s4, %s2381_s4 }
 0x109   : > { %p2384_p5 = pnand %p2382_p4, %p2808_p8  ;;  %p2391_p0 = por %p2390_p13, %p2389_p12 }
 0x10b   : > { %p2385_p10 = pneg %p2384_p5 }
 0x10d   : > { %p2392_p3 = pnand %p2391_p0, %p2385_p10 }
 0x10f   : > { %2395 = shalt.err (!%p2392_p3)
}
 0x110   : > { %1982 = dma.hbm_to_vmem [thread:$0]  (!%p3425_p6), %s3428_s5, 256, %s423_s28, [#allocation10], %s3427_s12, %s3427_s12, %s3426_s22  }
 0x111   : > { %s3429_s17 = sld [smem:[#allocation44_spill]] }
 0x117   : > { %s2396_s23 = scalar_lea.hbm %s3429_s17, 16 }
 0x118   : > { %p2397_p7 = scmp.ne.s32.totalorder %s3429_s17, %s2396_s23  ;;  %p2403_p2 = scmp.lt.u32.totalorder %s2396_s23, %s3429_s17 }
 0x11a   : > { %p2399_p3 = pnand %p2397_p7, %p2808_p8 }
 0x11c   : > { %p2400_p11 = pneg %p2399_p3 }
 0x11e   : > { %p2405_p1 = pnand %p2403_p2, %p2400_p11 }
 0x120   : > { %2408 = shalt.err (!%p2405_p1)
}
 0x121   : > { %s2409_s4 = scalar_lea.vmem %s448_s15, 16  ;;  %s2416_s28 = scalar_lea.vmem %s448_s15, 32 }
 0x122   : > { %p2410_p9 = scmp.ne.s32.totalorder %s448_s15, %s2409_s4  ;;  %p2417_p10 = scmp.lt.s32.totalorder %s448_s15, %s448_s15 }
 0x123   : > { %p2418_p12 = scmp.lt.s32.totalorder %s2416_s28, %s2409_s4 }
 0x124   : > { %p2412_p4 = pnand %p2410_p9, %p2808_p8 }
 0x125   : > { %p2419_p13 = por %p2418_p12, %p2417_p10 }
 0x126   : > { %p2413_p5 = pneg %p2412_p4 }
 0x128   : > { %p2420_p0 = pnand %p2419_p13, %p2413_p5 }
 0x12a   : > { %2423 = shalt.err (!%p2420_p0)
}
 0x12b   : > { %1988 = dma.hbm_to_vmem [thread:$0]  (!%p3425_p6), %s3429_s17, 16, %s448_s15, [#allocation13]  }
 0x12c   : > { %s2667_s21 = smov [#allocation17]   ;;  %s2668_s23 = smov [#allocation20]  }
 0x12d   : > { %s468_s9 = sshll.u32 %s2667_s21, 4  ;;  %s493_s8 = sshll.u32 %s2668_s23, 4  ;;  %s469_s9 = int_to_ptr.vmem [resolvable:$true] %s468_s9  ;;  %s494_s8 = int_to_ptr.vmem [resolvable:$true] %s493_s8 }
 0x12e   : > { %s3430_s0 = sld [smem:[#allocation46_spill]] }
 0x134   : > { %s2424_s3 = scalar_lea.hbm %s3430_s0, 256 }
 0x135   : > { %p2425_p7 = scmp.ne.s32.totalorder %s3430_s0, %s2424_s3  ;;  %p2431_p2 = scmp.lt.u32.totalorder %s2424_s3, %s3430_s0 }
 0x137   : > { %p2427_p3 = pnand %p2425_p7, %p2808_p8 }
 0x139   : > { %p2428_p11 = pneg %p2427_p3 }
 0x13b   : > { %p2433_p1 = pnand %p2431_p2, %p2428_p11 }
 0x13d   : > { %2436 = shalt.err (!%p2433_p1)
}
 0x13e   : > { %s2437_s15 = scalar_lea.vmem %s469_s9, 256  ;;  %p2445_p10 = scmp.lt.s32.totalorder %s469_s9, %s469_s9 }
 0x13f   : > { %p2438_p9 = scmp.ne.s32.totalorder %s469_s9, %s2437_s15  ;;  %p2446_p12 = scmp.lt.s32.totalorder %s2437_s15, %s2437_s15 }
 0x141   : > { %p2440_p4 = pnand %p2438_p9, %p2808_p8  ;;  %p2447_p13 = por %p2446_p12, %p2445_p10 }
 0x143   : > { %p2441_p5 = pneg %p2440_p4 }
 0x145   : > { %p2448_p0 = pnand %p2447_p13, %p2441_p5 }
 0x147   : > { %2451 = shalt.err (!%p2448_p0)
}
 0x148   : > { %1994 = dma.hbm_to_vmem [thread:$0]  (!%p3425_p6), %s3430_s0, 256, %s469_s9, [#allocation16], %s3427_s12, %s3427_s12, %s3426_s22  }
 0x149   : > { %s3431_s23 = sld [smem:[#allocation48_spill]] }
 0x14f   : > { %s2452_s19 = scalar_lea.hbm %s3431_s23, 16 }
 0x150   : > { %p2453_p7 = scmp.ne.s32.totalorder %s3431_s23, %s2452_s19  ;;  %p2459_p2 = scmp.lt.u32.totalorder %s2452_s19, %s3431_s23 }
 0x152   : > { %p2455_p3 = pnand %p2453_p7, %p2808_p8 }
 0x154   : > { %p2456_p11 = pneg %p2455_p3 }
 0x156   : > { %p2461_p1 = pnand %p2459_p2, %p2456_p11 }
 0x158   : > { %2464 = shalt.err (!%p2461_p1)
}
 0x159   : > { %s2465_s15 = scalar_lea.vmem %s494_s8, 16  ;;  %s2472_s22 = scalar_lea.vmem %s494_s8, 32 }
 0x15a   : > { %p2466_p9 = scmp.ne.s32.totalorder %s494_s8, %s2465_s15  ;;  %p2473_p10 = scmp.lt.s32.totalorder %s494_s8, %s494_s8 }
 0x15b   : > { %p2474_p12 = scmp.lt.s32.totalorder %s2472_s22, %s2465_s15 }
 0x15c   : > { %p2468_p4 = pnand %p2466_p9, %p2808_p8 }
 0x15d   : > { %p2475_p13 = por %p2474_p12, %p2473_p10 }
 0x15e   : > { %p2469_p5 = pneg %p2468_p4 }
 0x160   : > { %p2476_p0 = pnand %p2475_p13, %p2469_p5 }
 0x162   : > { %2479 = shalt.err (!%p2476_p0)
}
 0x163   : > { %2000 = dma.hbm_to_vmem [thread:$0]  (!%p3425_p6), %s3431_s23, 16, %s494_s8, [#allocation19]  }
 0x164   : > { %s2669_s5 = smov [#allocation21]   ;;  %s1763_s11 = sshll.u32 %s2648_s29, 4 }
 0x165   : > { %s504_s3 = sshll.u32 %s2669_s5, 4  ;;  %s3432_s6 = sld [smem:[#allocation49_spill]]  ;;  %s505_s3 = int_to_ptr.vmem [resolvable:$true] %s504_s3 }
 0x16b   : > { %s2480_s4 = scalar_lea.hbm %s3432_s6, 16 }
 0x16c   : > { %p2481_p7 = scmp.ne.s32.totalorder %s3432_s6, %s2480_s4  ;;  %p2487_p2 = scmp.lt.u32.totalorder %s2480_s4, %s3432_s6 }
 0x16e   : > { %p2483_p3 = pnand %p2481_p7, %p2808_p8 }
 0x170   : > { %p2484_p11 = pneg %p2483_p3 }
 0x172   : > { %p2489_p1 = pnand %p2487_p2, %p2484_p11 }
 0x174   : > { %2492 = shalt.err (!%p2489_p1)
}
 0x175   : > { %s2493_s8 = scalar_lea.vmem %s505_s3, 16  ;;  %s2500_s12 = scalar_lea.vmem %s505_s3, 32 }
 0x176   : > { %p2494_p9 = scmp.ne.s32.totalorder %s505_s3, %s2493_s8  ;;  %p2501_p10 = scmp.lt.s32.totalorder %s505_s3, %s505_s3 }
 0x177   : > { %p2502_p12 = scmp.lt.s32.totalorder %s2500_s12, %s2493_s8 }
 0x178   : > { %p2496_p4 = pnand %p2494_p9, %p2808_p8 }
 0x179   : > { %p2503_p13 = por %p2502_p12, %p2501_p10 }
 0x17a   : > { %p2497_p5 = pneg %p2496_p4 }
 0x17c   : > { %p2504_p0 = pnand %p2503_p13, %p2497_p5 }
 0x17e   : > { %2507 = shalt.err (!%p2504_p0)
}
 0x17f   : > { %2003 = dma.hbm_to_vmem [thread:$0]  (!%p3425_p6), %s3432_s6, 16, %s505_s3, [#allocation22]  }
 0x180   : > { %s3433_s4 = sld [smem:[#allocation39_spill]]  ;;  %s3434_s28 = sand.u32 1, %s2640_s27  }
 0x181   : > { %s539_s10 = scalar_lea.vmem [#allocation7], %s3434_s28  ;;  %p3435_p7 = scmp.ne.s32.totalorder %s3421_s1, 0 }
 0x182   : > { %s546_s15 = sshll.u32 %s539_s10, 4  ;;  %s547_s15 = int_to_ptr.vmem [resolvable:$true] %s546_s15 }
 0x183   : > { %p3436_p3 = pneg %p3435_p7 }
 0x186   : > { %s3110_s16 = scalar_lea.hbm %s3433_s4, %s1763_s11  ;;  %s2513_s8 = scalar_lea.hbm %s3433_s4, 32 }
 0x187   : > { %s2508_s18 = scalar_lea.hbm %s3110_s16, 16  ;;  %p2514_p6 = scmp.lt.u32.totalorder %s3110_s16, %s3433_s4 }
 0x188   : > { %p2509_p8 = scmp.ne.s32.totalorder %s3110_s16, %s2508_s18  ;;  %p2515_p1 = scmp.lt.u32.totalorder %s2513_s8, %s2508_s18 }
 0x189   : > { %p2517_p4 = scmp.lt.u32.totalorder %s2508_s18, %s3110_s16 }
 0x18a   : > { %p2511_p11 = pnand %p2509_p8, %p3436_p3  ;;  %p2516_p9 = por %p2515_p1, %p2514_p6 }
 0x18c   : > { %p2512_p2 = pneg %p2511_p11  ;;  %p2518_p5 = por %p2517_p4, %p2516_p9 }
 0x18e   : > { %p2519_p10 = pnand %p2518_p5, %p2512_p2 }
 0x190   : > { %2522 = shalt.err (!%p2519_p10)
}
 0x191   : > { %s2523_s9 = scalar_lea.vmem %s547_s15, 16  ;;  %p3437_p13 = pmov %p3436_p3 }
 0x192   : > { %p2524_p12 = scmp.ne.s32.totalorder %s547_s15, %s2523_s9  ;;  %s2670_s5 = smov [#allocation7]  }
 0x193   : > { %s2528_s21 = sshll.u32 %s2670_s5, 4  ;;  %s2529_s21 = int_to_ptr.vmem [resolvable:$false] %s2528_s21 }
 0x194   : > { %p2526_p0 = pnand %p2524_p12, %p3437_p13  ;;  %s2530_s19 = scalar_lea.vmem %s2529_s21, 32 }
 0x195   : > { %p2531_p3 = scmp.lt.s32.totalorder %s547_s15, %s2529_s21  ;;  %p2532_p11 = scmp.lt.s32.totalorder %s2530_s19, %s2523_s9 }
 0x196   : > { %p2527_p8 = pneg %p2526_p0 }
 0x197   : > { %p2533_p1 = por %p2532_p11, %p2531_p3 }
 0x199   : > { %p2534_p6 = pnand %p2533_p1, %p2527_p8 }
 0x19b   : > { %2537 = shalt.err (!%p2534_p6)
}
 0x19c   : > { %2010 = dma.hbm_to_vmem [thread:$0]  (!%p3435_p7), %s3110_s16, 16, %s547_s15, %s2957_s13  }
 0x19d   : > { %s3438_s28 = sld [smem:[#allocation35_spill]] }
 0x1a3   : > { %p3439_p2 = scmp.ne.s32.totalorder %s3438_s28, 0 }
 0x1a4   : > { %s557_s10 = sand.u32 (!%p3439_p2), 1, %s2782_s14   ;;  %s3138_s18 = sand.u32 (!%p3439_p2), 1, %s2636_s26  }
 0x1a5   : > { %555 = sbr.rel (%p3439_p2) target bundleno = 2238 (0x8be), region = 72  ;;  %s1765_s3 = sshll.u32 (!%p3439_p2), %s3138_s18, 4 }
 0x1a6   : > { %s558_s22 = scalar_lea.sflag (!%p3439_p2), [#allocation3], %s557_s10  ;;  %s3143_s8 = scalar_lea.vmem (!%p3439_p2), [#allocation2], %s1765_s3 }
 0x1a7   : > { %p3440_p9 = scmp.ne.s32.totalorder (!%p3439_p2), %s3417_s24, 0 }
 0x1ac   : > { %2591 = dma.done.wait (%p3440_p9), %s558_s22, 256  }
 0x1ad   : > { %2593 = vsyncadd (%p3440_p9), %s558_s22, 4294967040  ;;  %p3441_p7 = scmp.eq.s32.totalorder %s2782_s14, 0 }
 0x1af   : > { %2595 = dma.done.wait (%p3441_p7), [#allocation6], 256   ;;  %p3442_p4 = pmov %p3441_p7 }
 0x1b0   : > { %s573_s1 = scalar_lea.vmem [#allocation7], %s3138_s18 }
 0x1b1   : > { %2597 = vsyncadd (%p3442_p4), [#allocation6], 4294967040 }
 0x1b2   : > { %2599 = dma.done.wait (%p3440_p9), %s558_s22, 16  }
 0x1b3   : > { %2601 = vsyncadd (%p3440_p9), %s558_s22, 4294967280  ;;  %p3443_p5 = pmov %p3442_p4 }
 0x1b4   : > { %p3444_p10 = pmov %p3442_p4 }
 0x1b5   : > { %2603 = dma.done.wait (%p3443_p5), [#allocation6], 256  }
 0x1b6   : > { %2605 = vsyncadd (%p3444_p10), [#allocation6], 4294967040  ;;  %p3445_p12 = pmov %p3442_p4 }
 0x1b7   : > { %p3446_p13 = pmov %p3442_p4 }
 0x1b8   : > { %2607 = dma.done.wait (%p3445_p12), [#allocation10], 512  }
 0x1b9   : > { %2609 = vsyncadd (%p3446_p13), [#allocation10], 4294966784  ;;  %p3447_p0 = pmov %p3442_p4 }
 0x1bb   : > { %2611 = dma.done.wait (%p3447_p0), [#allocation13], 32   ;;  %p3448_p8 = pmov %p3447_p0 }
 0x1bc   : > { %p3449_p3 = pmov %p3447_p0 }
 0x1bd   : > { %2613 = vsyncadd (%p3448_p8), [#allocation13], 4294967264 }
 0x1be   : > { %2615 = dma.done.wait (%p3449_p3), [#allocation16], 272   ;;  %p3450_p11 = pmov %p3447_p0 }
 0x1bf   : > { %p3451_p1 = pmov %p3447_p0 }
 0x1c0   : > { %2617 = vsyncadd (%p3450_p11), [#allocation16], 4294967024 }
 0x1c1   : > { %2619 = dma.done.wait (%p3451_p1), [#allocation19], 32   ;;  %p3452_p6 = pmov %p3447_p0 }
 0x1c2   : > { %p3453_p2 = pmov %p3447_p0 }
 0x1c3   : > { %2621 = vsyncadd (%p3452_p6), [#allocation19], 4294967264 }
 0x1c4   : > { %2623 = dma.done.wait (%p3453_p2), [#allocation22], 16   ;;  %p3454_p9 = pmov %p3447_p0 }
 0x1c5   : > { %v2671_v0 = vmov 0.0   ;;  %vm2672_vm0 = vmmov 0   ;;  %v2126_v1 = vld [vmem:[#allocation9] sm:$0xff]   ;;  %v2127_v2 = vld [vmem:[#allocation8] sm:$0xff]   ;;  %v2128_v3 = vld [vmem:[#allocation9 + $0x8] sm:$0xff]   ;;  %vm717_vm1 = vcmask 261120  }
 0x1c6   : > { %2625 = vsyncadd (%p3454_p9), [#allocation22], 4294967280  ;;  %1848 = vmatprep.subr.bf16.mxu1 %v2671_v0  ;;  %1840 = vmatprep.subr.bf16.mxu0 %v2671_v0  ;;  %v2129_v4 = vld [vmem:[#allocation8 + $0x8] sm:$0xff]   ;;  %v1779_v8 = vld [vmem:[#allocation12] ss:$0 sm:$0xff]  ;;  %vm885_vm2 = vcmask 64512  }
 0x1c7   : > { %1852 = vmatprep.mubr.msk.bf16.mxu1 %vm2672_vm0, %v2671_v0  ;;  %1844 = vmatprep.mubr.msk.bf16.mxu0 %vm2672_vm0, %v2671_v0  ;;  %v3191_v5 = vld [vmem:[%s3143_s8] sm:$0xff]  ;;  %v3194_v6 = vld [vmem:[%s3143_s8 + $0x8] sm:$0xf]  ;;  %s2673_s14 = smov 112   ;;  %s2674_s24 = smov 120   ;;  %vm933_vm3 = vcmask 97280  }
 0x1c8   : > { %1849 = vmatpush3.bf16.msra.mxu1 %v2126_v1  ;;  %1841 = vmatpush3.bf16.msra.mxu0 %v2127_v2  ;;  %v698_v7 = vpack.c.bf16 %v3194_v6, %v3191_v5  ;;  %v1783_v9 = vld [vmem:[#allocation14] ss:$0 sm:$0xff]  ;;  %s2675_s13 = smov 104   ;;  %v2130_v27 = vld [vmem:[#allocation11] sm:$0xff]   ;;  %v2131_v28 = vld [vmem:[#allocation11 + $0x8] sm:$0xff]   ;;  %vm937_vm4 = vcmask 93184  }
 0x1c9   : > { %1850 = vmatprep.subr.bf16.mxu1 %v2671_v0  ;;  %1842 = vmatprep.subr.bf16.mxu0 %v2671_v0  ;;  %v665_v38 = vld [vmem:[#allocation5] sm:$0xff]  ;;  %v666_v40 = vld [vmem:[#allocation5 + $0x8] sm:$0xf]  ;;  %vm961_vm5 = vcmask 1045504   ;;  %s2676_s16 = smov 8   ;;  %s2677_s15 = smov 16  }
 0x1ca   : > { %v1778_v39 = vld [vmem:[%s573_s1] ss:$0 sm:$0xff]  ;;  %v1787_v51 = vld [vmem:[#allocation15] ss:$0 sm:$0xff]  ;;  %s2678_s11 = smov 24   ;;  %vm1404_vm6 = vcmask 130048  }
 0x1cb   : > { %v674_v41 = vadd.f32 %v1778_v39, %v665_v38  ;;  %v675_v42 = vadd.f32 %v1778_v39, %v666_v40  ;;  %vm1407_vm7 = vcmask 195584   ;;  %vm1478_vm8 = vcmask 257024   ;;  %s3455_s12 = sld [smem:[#allocation34_spill]]  ;;  %s659_s5 = scalar_lea.vmem [#allocation23], %s1765_s3 }
 0x1cc   : > { %1851 = vmatpush3.bf16.msra.mxu1 %v2128_v3  ;;  %1843 = vmatpush3.bf16.msra.mxu0 %v2129_v4  ;;  %s1537_s21 = sshll.u32 %s659_s5, 4  ;;  %s3456_s10 = sld [smem:[#allocation50_spill]]  ;;  %s3301_s21 = int_to_ptr.vmem [resolvable:$true] %s1537_s21 }
 0x1cd   : > { %1864 = vmatprep.subr.bf16.mxu1 %v2671_v0  ;;  %1856 = vmatprep.subr.bf16.mxu0 %v2671_v0  ;;  %s1522_s8 = scalar_lea.sflag [#allocation4], %s3138_s18  ;;  %s2538_s1 = scalar_lea.vmem %s3301_s21, 256 }
 0x1ce   : > { %p2539_p7 = scmp.ne.s32.totalorder %s3301_s21, %s2538_s1  ;;  %p3457_p4 = scmp.ne.s32.totalorder %s3418_s2, 0 }
 0x1cf   : > { %1853 = vmatmul.mubr.msk.bf16.vlgmr.msra.gmra.mrb[0].mxu1 %vm717_vm1, %v698_v7  ;;  %1845 = vmatmul.mubr.msk.bf16.vlgmr.msra.gmra.mrb[0].mxu0 %vm717_vm1, %v698_v7  ;;  %s2679_s3 = smov [#allocation23]  }
 0x1d0   : > { %1866 = vmatprep.mubr.msk.bf16.mxu1 %vm2672_vm0, %v2671_v0  ;;  %1860 = vmatprep.mubr.msk.bf16.mxu0 %vm2672_vm0, %v2671_v0  ;;  %p2540_p5 = pnand %p2539_p7, %p3457_p4 }
 0x1d1   : > { %1857 = vmatpush3.bf16.msra.mxu0 %v2130_v27  ;;  %s1811_s9 = sshll.u32 %s3455_s12, 8 }
 0x1d2   : > { %1858 = vmatprep.subr.bf16.mxu0 %v2671_v0  ;;  %s3299_s22 = scalar_lea.hbm %s3456_s10, %s1811_s9  ;;  %p2541_p10 = pneg %p2540_p5 }
 0x1d5   : > { %1859 = vmatpush3.bf16.msra.mxu0 %v2131_v28 }
 0x1d6   : > { %1870 = vmatprep.subr.bf16.mxu0 %v2671_v0 }
 0x1d8   : > { %1861 = vmatmul.mubr.msk.bf16.vlgmr.msra.gmra.mrb[4].mxu0 %vm717_vm1, %v698_v7 }
 0x1d9   : > { %1872 = vmatprep.mubr.msk.bf16.mxu0 %vm2672_vm0, %v2671_v0 }
 0x2a2   : > { %v816_v10 = vpop.f32.mrb[0].mxu1  ;;  %v755_v12 = vpop.f32.mrb[0].mxu0 }
 0x2a3   : > { %v1854_v11 = vpop.f32.mrb[1].mxu1  ;;  %v756_v13 = vadd.f32 %v1779_v8, %v755_v12  ;;  %v1846_v15 = vpop.f32.mrb[1].mxu0  ;;  %v817_v16 = vadd.f32 %v1783_v9, %v816_v10 }
 0x2a4   : > { %v819_v14 = vpop.f32.mrb[2].mxu1  ;;  %v758_v19 = vpop.f32.mrb[2].mxu0 }
 0x2a5   : > { %v820_v17 = vadd.f32 %v1783_v9, %v819_v14  ;;  %v1855_v18 = vpop.f32.mrb[3].mxu1  ;;  %v762_v20 = vmul.f32 0.35355338, %v756_v13  ;;  %v759_v21 = vadd.f32 %v1779_v8, %v758_v19  ;;  %v1847_v22 = vpop.f32.mrb[3].mxu0 }
 0x2a7   : > { %v883_v23 = vpack.c.bf16 %v820_v17, %v817_v16  ;;  %v763_v24 = vmul.f32 0.35355338, %v759_v21 }
 0x2a9   : > { %1134 = vrot.lane.b32.xlu1 %v883_v23, %s2673_s14  ;;  %1010 = vrot.lane.b32.xlu0 %v883_v23, %s2674_s24  ;;  %v890_v25 = vsel %vm885_vm2, %v883_v23, 0  ;;  %v882_v26 = vpack.c.bf16 %v763_v24, %v762_v20 }
 0x2aa   : > { %1865 = vmatpush3.bf16.xpose.msra.mxu1 %v890_v25 }
 0x2ab   : > { %1876 = vmatprep.subr.bf16.mxu1 %v2671_v0  ;;  %v875_v52 = vpop.f32.mrb[4].mxu0 }
 0x2ac   : > { %v876_v53 = vadd.f32 %v1787_v51, %v875_v52  ;;  %v1862_v54 = vpop.f32.mrb[5].mxu0 }
 0x2ad   : > { %1132 = vrot.lane.b32.xlu1 %v882_v26, %s2673_s14  ;;  %1007 = vrot.lane.b32.xlu0 %v882_v26, %s2674_s24  ;;  %v878_v55 = vpop.f32.mrb[6].mxu0 }
 0x2ae   : > { %v879_v56 = vadd.f32 %v1787_v51, %v878_v55  ;;  %v1863_v57 = vpop.f32.mrb[7].mxu0 }
 0x2b0   : > { %v3241_v58 = vpack.c.bf16 %v879_v56, %v876_v53 }
 0x2b1   : > { %1255 = vrot.lane.b32.xlu1 %v882_v26, %s2675_s13  ;;  %1257 = vrot.lane.b32.xlu0 %v883_v23, %s2675_s13 }
 0x2b2   : > { %1867 = vmatmul.mubr.msk.bf16.vlgmr.msra.gmra.mrb[4].mxu1 %vm885_vm2, %v882_v26  ;;  %v963_v59 = vsel %vm961_vm5, %v3241_v58, 0 }
 0x2b3   : > { %1878 = vmatprep.mubr.msk.bf16.mxu1 %vm2672_vm0, %v2671_v0  ;;  %1871 = vmatpush3.bf16.msra.mxu0 %v963_v59 }
 0x2b4   : > { %1882 = vmatprep.subr.bf16.mxu0 %v2671_v0 }
 0x31b   : > { %v1011_v29 = vpop.permute.xlu0 %1010  ;;  %v1135_v31 = vpop.permute.xlu1 %1134 }
 0x31c   : > { %v1016_v30 = vsel %vm885_vm2, %v1011_v29, 0  ;;  %v1140_v33 = vsel %vm885_vm2, %v1135_v31, 0 }
 0x31d   : > { %1877 = vmatpush3.bf16.xpose.msra.mxu1 %v1016_v30 }
 0x31e   : > { %1888 = vmatprep.subr.bf16.mxu1 %v2671_v0 }
 0x31f   : > { %v1008_v32 = vpop.permute.xlu0 %1007  ;;  %v1133_v35 = vpop.permute.xlu1 %1132 }
 0x323   : > { %v1258_v34 = vpop.permute.xlu0 %1257  ;;  %v1256_v37 = vpop.permute.xlu1 %1255 }
 0x324   : > { %1879 = vmatmul.mubr.msk.bf16.vlgmr.msra.gmra.mrb[8].mxu1 %vm885_vm2, %v1008_v32  ;;  %v1263_v36 = vsel %vm885_vm2, %v1258_v34, 0 }
 0x325   : > { %1889 = vmatpush3.bf16.xpose.msra.mxu1 %v1140_v33  ;;  %1890 = vmatprep.mubr.msk.bf16.mxu1 %vm2672_vm0, %v2671_v0 }
 0x326   : > { %1900 = vmatprep.subr.bf16.mxu1 %v2671_v0 }
 0x32c   : > { %1891 = vmatmul.mubr.msk.bf16.vlgmr.msra.gmra.mrb[12].mxu1 %vm885_vm2, %v1133_v35 }
 0x32d   : > { %1901 = vmatpush3.bf16.xpose.msra.mxu1 %v1263_v36  ;;  %1902 = vmatprep.mubr.msk.bf16.mxu1 %vm2672_vm0, %v2671_v0 }
 0x32e   : > { %1912 = vmatprep.subr.bf16.mxu1 %v2671_v0 }
 0x334   : > { %1903 = vmatmul.mubr.msk.bf16.vlgmr.msra.gmra.mrb[16].mxu1 %vm885_vm2, %v1256_v37 }
 0x335   : > { %1916 = vmatprep.mubr.msk.bf16.mxu1 %vm2672_vm0, %v2671_v0 }
 0x385   : > { %v926_v43 = vpop.f32.mrb[4].mxu1 }
 0x386   : > { %v927_v44 = vadd.f32 %v926_v43, %v674_v41  ;;  %v1868_v45 = vpop.f32.mrb[5].mxu1 }
 0x387   : > { %v929_v46 = vpop.f32.mrb[6].mxu1 }
 0x388   : > { %v930_v47 = vadd.f32 %v929_v46, %v675_v42  ;;  %v1869_v48 = vpop.f32.mrb[7].mxu1  ;;  %v934_v49 = vsel %vm933_vm3, %v927_v44, -inf }
 0x389   : > { %935 = vmax.xlane.f32.xlu0 %v934_v49 }
 0x38a   : > { %v938_v50 = vsel %vm937_vm4, %v930_v47, -inf }
 0x38b   : > { %939 = vmax.xlane.f32.xlu1 %v938_v50 }
 0x3f7   : > { %v1052_v60 = vpop.f32.mrb[8].mxu1 }
 0x3f8   : > { %v1053_v61 = vadd.f32 %v1052_v60, %v674_v41  ;;  %v1880_v62 = vpop.f32.mrb[9].mxu1 }
 0x3f9   : > { %v1055_v63 = vpop.f32.mrb[10].mxu1 }
 0x3fa   : > { %v1056_v1 = vadd.f32 %v1055_v63, %v675_v42  ;;  %v1881_v2 = vpop.f32.mrb[11].mxu1  ;;  %v1059_v3 = vsel %vm933_vm3, %v1053_v61, -inf }
 0x3fb   : > { %1060 = vmax.xlane.f32.xlu0 %v1059_v3 }
 0x3fc   : > { %v1062_v4 = vsel %vm937_vm4, %v1056_v1, -inf }
 0x3ff   : > { %1063 = vmax.xlane.f32.xlu0 %v1062_v4  ;;  %v1176_v7 = vpop.f32.mrb[12].mxu1 }
 0x400   : > { %v1177_v8 = vadd.f32 %v1176_v7, %v674_v41  ;;  %v1892_v9 = vpop.f32.mrb[13].mxu1 }
 0x401   : > { %v1179_v10 = vpop.f32.mrb[14].mxu1 }
 0x402   : > { %v1180_v11 = vadd.f32 %v1179_v10, %v675_v42  ;;  %v1893_v12 = vpop.f32.mrb[15].mxu1  ;;  %v1183_v13 = vsel %vm933_vm3, %v1177_v8, -inf }
 0x403   : > { %1184 = vmax.xlane.f32.xlu1 %v1183_v13 }
 0x404   : > { %v1186_v14 = vsel %vm937_vm4, %v1180_v11, -inf }
 0x405   : > { %1187 = vmax.xlane.f32.xlu0 %v1186_v14 }
 0x407   : > { %v1299_v15 = vpop.f32.mrb[16].mxu1 }
 0x408   : > { %v1300_v16 = vadd.f32 %v1299_v15, %v674_v41  ;;  %v1904_v17 = vpop.f32.mrb[17].mxu1 }
 0x409   : > { %v1302_v18 = vpop.f32.mrb[18].mxu1 }
 0x40a   : > { %v1303_v19 = vadd.f32 %v1302_v18, %v675_v42  ;;  %v1905_v20 = vpop.f32.mrb[19].mxu1  ;;  %v1306_v21 = vsel %vm933_vm3, %v1300_v16, -inf }
 0x40b   : > { %1307 = vmax.xlane.f32.xlu1 %v1306_v21 }
 0x40c   : > { %v1309_v22 = vsel %vm937_vm4, %v1303_v19, -inf }
 0x40d   : > { %1310 = vmax.xlane.f32.xlu0 %v1309_v22 }
 0x416   : > { %v936_v23 = vpop.xlane.xlu0 %935 }
 0x417   : > { %v941_v24 = vsub.f32 %v927_v44, %v936_v23 }
 0x418   : > { %v940_v25 = vpop.xlane.xlu1 %939 }
 0x419   : > { %v943_v26 = vmul.f32 1.442695, %v941_v24  ;;  %v942_v27 = vsub.f32 %v930_v47, %v940_v25 }
 0x41b   : > { %2134 = vpow2.f32 %v943_v26  ;;  %v945_v28 = vmul.f32 1.442695, %v942_v27 }
 0x41d   : > { %2136 = vpow2.f32 %v945_v28 }
 0x425   : > { %v2135_v29 = vpop.eup %2134 }
 0x426   : > { %v947_v30 = vsel %vm933_vm3, %v2135_v29, 0.0 }
 0x427   : > { %v2137_v31 = vpop.eup %2136  ;;  %948 = vadd.xlane.f32.xlu1 %v947_v30 }
 0x428   : > { %v950_v32 = vsel %vm937_vm4, %v2137_v31, 0.0 }
 0x429   : > { %951 = vadd.xlane.f32.xlu0 %v950_v32 }
 0x438   : > { %1083 = vrot.lane.b32.xlu1 %v3241_v58, %s2674_s24 }
 0x488   : > { %v1061_v33 = vpop.xlane.xlu0 %1060 }
 0x489   : > { %v1065_v34 = vsub.f32 %v1053_v61, %v1061_v33 }
 0x48b   : > { %v1067_v35 = vmul.f32 1.442695, %v1065_v34 }
 0x48c   : > { %v1064_v36 = vpop.xlane.xlu0 %1063 }
 0x48d   : > { %2138 = vpow2.f32 %v1067_v35  ;;  %v1066_v37 = vsub.f32 %v1056_v1, %v1064_v36 }
 0x48f   : > { %v1069_v38 = vmul.f32 1.442695, %v1066_v37 }
 0x490   : > { %v1185_v39 = vpop.xlane.xlu1 %1184 }
 0x491   : > { %2140 = vpow2.f32 %v1069_v38  ;;  %v1189_v40 = vsub.f32 %v1177_v8, %v1185_v39 }
 0x492   : > { %v1188_v41 = vpop.xlane.xlu0 %1187 }
 0x493   : > { %v1191_v42 = vmul.f32 1.442695, %v1189_v40  ;;  %v1190_v43 = vsub.f32 %v1180_v11, %v1188_v41 }
 0x495   : > { %2142 = vpow2.f32 %v1191_v42  ;;  %v1193_v44 = vmul.f32 1.442695, %v1190_v43  ;;  %v2132_v43 = vld [vmem:[#allocation17] sm:$0xff]  }
 0x496   : > { %1913 = vmatpush3.bf16.msra.mxu1 %v2132_v43 }
 0x497   : > { %v2139_v45 = vpop.eup %2138  ;;  %2144 = vpow2.f32 %v1193_v44  ;;  %1914 = vmatprep.subr.bf16.mxu1 %v2671_v0 }
 0x498   : > { %v1308_v46 = vpop.xlane.xlu1 %1307  ;;  %v1071_v47 = vsel %vm933_vm3, %v2139_v45, 0.0 }
 0x499   : > { %v1312_v48 = vsub.f32 %v1300_v16, %v1308_v46  ;;  %1072 = vadd.xlane.f32.xlu1 %v1071_v47 }
 0x49a   : > { %v1311_v49 = vpop.xlane.xlu0 %1310 }
 0x49b   : > { %v2141_v50 = vpop.eup %2140  ;;  %v1314_v51 = vmul.f32 1.442695, %v1312_v48  ;;  %v1313_v52 = vsub.f32 %v1303_v19, %v1311_v49  ;;  %v2133_v48 = vld [vmem:[#allocation17 + $0x8] sm:$0xff]  }
 0x49c   : > { %v1074_v53 = vsel %vm937_vm4, %v2141_v50, 0.0  ;;  %1915 = vmatpush3.bf16.msra.mxu1 %v2133_v48 }
 0x49d   : > { %2146 = vpow2.f32 %v1314_v51  ;;  %v1316_v54 = vmul.f32 1.442695, %v1313_v52  ;;  %1075 = vadd.xlane.f32.xlu0 %v1074_v53 }
 0x49f   : > { %v2143_v55 = vpop.eup %2142  ;;  %2148 = vpow2.f32 %v1316_v54 }
 0x4a0   : > { %v1195_v56 = vsel %vm933_vm3, %v2143_v55, 0.0 }
 0x4a1   : > { %v2145_v57 = vpop.eup %2144  ;;  %1196 = vadd.xlane.f32.xlu1 %v1195_v56 }
 0x4a2   : > { %v1198_v59 = vsel %vm937_vm4, %v2145_v57, 0.0 }
 0x4a3   : > { %1199 = vadd.xlane.f32.xlu0 %v1198_v59 }
 0x4a7   : > { %v2147_v60 = vpop.eup %2146 }
 0x4a8   : > { %v1318_v61 = vsel %vm933_vm3, %v2147_v60, 0.0 }
 0x4a9   : > { %v2149_v62 = vpop.eup %2148  ;;  %1319 = vadd.xlane.f32.xlu1 %v1318_v61 }
 0x4aa   : > { %v1321_v63 = vsel %vm937_vm4, %v2149_v62, 0.0 }
 0x4ab   : > { %1322 = vadd.xlane.f32.xlu0 %v1321_v63 }
 0x4b4   : > { %v949_v1 = vpop.xlane.xlu1 %948 }
 0x4b5   : > { %2150 = vrcp.f32 %v949_v1 }
 0x4b6   : > { %v952_v2 = vpop.xlane.xlu0 %951 }
 0x4b7   : > { %2152 = vrcp.f32 %v952_v2 }
 0x4b8   : > { %v1084_v7 = vpop.permute.xlu1 %1083 }
 0x4b9   : > { %v1089_v11 = vsel %vm961_vm5, %v1084_v7, 0 }
 0x4ba   : > { %1329 = vrot.lane.b32.xlu1 %v3241_v58, %s2675_s13 }
 0x4bf   : > { %v2151_v3 = vpop.eup %2150 }
 0x4c0   : > { %v955_v8 = vmul.f32 %v2151_v3, %v2135_v29 }
 0x4c1   : > { %v2153_v4 = vpop.eup %2152  ;;  %1206 = vrot.lane.b32.xlu0 %v3241_v58, %s2673_s14  ;;  %s2542_s14 = sshll.u32 %s2679_s3, 4  ;;  %s2543_s14 = int_to_ptr.vmem [resolvable:$false] %s2542_s14 }
 0x4c2   : > { %v956_v9 = vmul.f32 %v2153_v4, %v2137_v31  ;;  %s2544_s24 = scalar_lea.vmem %s2543_s14, 512  ;;  %p2545_p12 = scmp.lt.s32.totalorder %s3301_s21, %s2543_s14 }
 0x4c3   : > { %p2546_p13 = scmp.lt.s32.totalorder %s2544_s24, %s2538_s1 }
 0x4c4   : > { %v957_v10 = vpack.c.bf16 %v956_v9, %v955_v8 }
 0x4c5   : > { %p2547_p0 = por %p2546_p13, %p2545_p12 }
 0x4c6   : > { %1873 = vmatmul.mubr.msk.bf16.vlgmr.msra.gmra.mrb[8].mxu0 %vm933_vm3, %v957_v10 }
 0x4c7   : > { %1883 = vmatpush3.bf16.msra.mxu0 %v1089_v11  ;;  %1884 = vmatprep.mubr.msk.bf16.mxu0 %vm2672_vm0, %v2671_v0  ;;  %p2548_p8 = pnand %p2547_p0, %p2541_p10 }
 0x4c8   : > { %1894 = vmatprep.subr.bf16.mxu0 %v2671_v0 }
 0x526   : > { %v1073_v12 = vpop.xlane.xlu1 %1072 }
 0x527   : > { %2154 = vrcp.f32 %v1073_v12  ;;  %v1799_v12 = vld [vmem:[#allocation18] ss:$0 sm:$0xff] }
 0x52a   : > { %v1076_v13 = vpop.xlane.xlu0 %1075 }
 0x52b   : > { %2156 = vrcp.f32 %v1076_v13 }
 0x52e   : > { %v1197_v14 = vpop.xlane.xlu1 %1196 }
 0x52f   : > { %2158 = vrcp.f32 %v1197_v14 }
 0x530   : > { %v1200_v58 = vpop.xlane.xlu0 %1199 }
 0x531   : > { %2160 = vrcp.f32 %v1200_v58  ;;  %v2155_v15 = vpop.eup %2154 }
 0x532   : > { %v1079_v17 = vmul.f32 %v2155_v15, %v2139_v45 }
 0x535   : > { %v2157_v16 = vpop.eup %2156 }
 0x536   : > { %v1080_v18 = vmul.f32 %v2157_v16, %v2141_v50  ;;  %v1320_v19 = vpop.xlane.xlu1 %1319 }
 0x537   : > { %2162 = vrcp.f32 %v1320_v19 }
 0x538   : > { %v1323_v20 = vpop.xlane.xlu0 %1322  ;;  %v1081_v21 = vpack.c.bf16 %v1080_v18, %v1079_v17 }
 0x539   : > { %2164 = vrcp.f32 %v1323_v20  ;;  %v2159_v22 = vpop.eup %2158 }
 0x53a   : > { %1885 = vmatmul.mubr.msk.bf16.vlgmr.msra.gmra.mrb[12].mxu0 %vm933_vm3, %v1081_v21  ;;  %v1203_v27 = vmul.f32 %v2159_v22, %v2143_v55  ;;  %v1330_v28 = vpop.permute.xlu1 %1329 }
 0x53b   : > { %v2161_v23 = vpop.eup %2160  ;;  %1896 = vmatprep.mubr.msk.bf16.mxu0 %vm2672_vm0, %v2671_v0  ;;  %v1335_v31 = vsel %vm961_vm5, %v1330_v28, 0 }
 0x53c   : > { %v1204_v24 = vmul.f32 %v2161_v23, %v2145_v57  ;;  %v1207_v25 = vpop.permute.xlu0 %1206 }
 0x53d   : > { %v1212_v26 = vsel %vm961_vm5, %v1207_v25, 0 }
 0x53e   : > { %1895 = vmatpush3.bf16.msra.mxu0 %v1212_v26  ;;  %v1205_v29 = vpack.c.bf16 %v1204_v24, %v1203_v27 }
 0x53f   : > { %1906 = vmatprep.subr.bf16.mxu0 %v2671_v0 }
 0x541   : > { %v2163_v30 = vpop.eup %2162 }
 0x542   : > { %1897 = vmatmul.mubr.msk.bf16.vlgmr.msra.gmra.mrb[16].mxu0 %vm933_vm3, %v1205_v29  ;;  %v1326_v34 = vmul.f32 %v2163_v30, %v2147_v60 }
 0x543   : > { %v2165_v32 = vpop.eup %2164  ;;  %1907 = vmatpush3.bf16.msra.mxu0 %v1335_v31  ;;  %1908 = vmatprep.mubr.msk.bf16.mxu0 %vm2672_vm0, %v2671_v0 }
 0x544   : > { %v1327_v33 = vmul.f32 %v2165_v32, %v2149_v62 }
 0x546   : > { %v1328_v35 = vpack.c.bf16 %v1327_v33, %v1326_v34 }
 0x54a   : > { %1909 = vmatmul.mubr.msk.bf16.vlgmr.msra.gmra.mrb[20].mxu0 %vm933_vm3, %v1328_v35 }
 0x599   : > { %v999_v36 = vpop.f32.mrb[8].mxu0 }
 0x59a   : > { %v1874_v37 = vpop.f32.mrb[9].mxu0 }
 0x59b   : > { %v1002_v38 = vpop.f32.mrb[10].mxu0  ;;  %v1803_v37 = vld [vmem:[#allocation20] ss:$0 sm:$0xff] }
 0x59c   : > { %v1875_v39 = vpop.f32.mrb[11].mxu0 }
 0x59d   : > { %v1804_v39 = vld [vmem:[#allocation21] ss:$0 sm:$0xff] }
 0x60d   : > { %v1125_v40 = vpop.f32.mrb[12].mxu0 }
 0x60e   : > { %v1886_v41 = vpop.f32.mrb[13].mxu0 }
 0x60f   : > { %v1128_v42 = vpop.f32.mrb[14].mxu0 }
 0x610   : > { %v2111_v44 = vpack.i.bf16 %v1128_v42, %v1125_v40  ;;  %v1887_v45 = vpop.f32.mrb[15].mxu0 }
 0x612   : > { %2112 = vrot.lane.b32.xlu1 %v2111_v44, %s2676_s16 }
 0x615   : > { %v1248_v46 = vpop.f32.mrb[16].mxu0 }
 0x616   : > { %v1898_v47 = vpop.f32.mrb[17].mxu0 }
 0x617   : > { %v1251_v49 = vpop.f32.mrb[18].mxu0 }
 0x618   : > { %v2116_v50 = vpack.i.bf16 %v1251_v49, %v1248_v46  ;;  %v1899_v51 = vpop.f32.mrb[19].mxu0 }
 0x61a   : > { %2117 = vrot.lane.b32.xlu0 %v2116_v50, %s2677_s15 }
 0x61d   : > { %v1371_v52 = vpop.f32.mrb[20].mxu0 }
 0x61e   : > { %v1910_v53 = vpop.f32.mrb[21].mxu0 }
 0x61f   : > { %v1374_v54 = vpop.f32.mrb[22].mxu0 }
 0x620   : > { %v2121_v55 = vpack.i.bf16 %v1374_v54, %v1371_v52  ;;  %v1911_v56 = vpop.f32.mrb[23].mxu0 }
 0x622   : > { %2122 = vrot.lane.b32.xlu1 %v2121_v55, %s2678_s11 }
 0x684   : > { %v2113_v57 = vpop.permute.xlu1 %2112 }
 0x685   : > { %v2115_v60 = vunpack.i.h.bf16 %v2113_v57  ;;  %v2114_v0 = vunpack.i.l.bf16 %v2113_v57 }
 0x687   : > { %v1403_v1 = vsel %vm885_vm2, %v1002_v38, %v2115_v60  ;;  %v1402_v2 = vsel %vm885_vm2, %v999_v36, %v2114_v0 }
 0x68c   : > { %v2118_v59 = vpop.permute.xlu0 %2117 }
 0x68d   : > { %v2120_v61 = vunpack.i.h.bf16 %v2118_v59  ;;  %v2119_v62 = vunpack.i.l.bf16 %v2118_v59 }
 0x68f   : > { %v1406_v7 = vsel %vm1404_vm6, %v1403_v1, %v2120_v61  ;;  %v1405_v8 = vsel %vm1404_vm6, %v1402_v2, %v2119_v62 }
 0x694   : > { %v2123_v63 = vpop.permute.xlu1 %2122 }
 0x695   : > { %v2125_v3 = vunpack.i.h.bf16 %v2123_v63  ;;  %v2124_v4 = vunpack.i.l.bf16 %v2123_v63 }
 0x697   : > { %v1409_v9 = vsel %vm1407_vm7, %v1406_v7, %v2125_v3  ;;  %v1408_v10 = vsel %vm1407_vm7, %v1405_v8, %v2124_v4 }
 0x698   : > { %v1410_v11 = vpack.c.bf16 %v1409_v9, %v1408_v10 }
 0x69a   : > { %1917 = vmatmul.mubr.msk.bf16.vlgmr.msra.gmra.mrb[20].mxu1 %vm717_vm1, %v1410_v11 }
 0x76d   : > { %v1466_v13 = vpop.f32.mrb[20].mxu1 }
 0x76e   : > { %v1467_v14 = vadd.f32 %v1799_v12, %v1466_v13  ;;  %v1918_v58 = vpop.f32.mrb[21].mxu1 }
 0x76f   : > { %v1469_v15 = vpop.f32.mrb[22].mxu1 }
 0x770   : > { %v1470_v16 = vadd.f32 %v1799_v12, %v1469_v15  ;;  %v1919_v17 = vpop.f32.mrb[23].mxu1  ;;  %v1473_v18 = vadd.f32 %v1467_v14, %v3191_v5 }
 0x772   : > { %v1475_v19 = vsel %vm717_vm1, %v1473_v18, 0.0  ;;  %v1474_v20 = vadd.f32 %v1470_v16, %v3194_v6 }
 0x773   : > { %1476 = vadd.xlane.f32.xlu0 %v1475_v19 }
 0x774   : > { %v1479_v21 = vsel %vm1478_vm8, %v1474_v20, 0.0 }
 0x775   : > { %1480 = vadd.xlane.f32.xlu1 %v1479_v21 }
 0x800   : > { %v1477_v22 = vpop.xlane.xlu0 %1476 }
 0x801   : > { %v1483_v23 = vmul.f32 0.03125, %v1477_v22 }
 0x802   : > { %v1481_v24 = vpop.xlane.xlu1 %1480 }
 0x803   : > { %v1485_v25 = vsub.f32 %v1473_v18, %v1483_v23  ;;  %v1484_v26 = vmul.f32 0.03125, %v1481_v24 }
 0x805   : > { %v1486_v27 = vsub.f32 %v1474_v20, %v1484_v26  ;;  %v1487_v28 = vmul.f32 %v1485_v25, %v1485_v25 }
 0x807   : > { %v1489_v29 = vsel %vm717_vm1, %v1487_v28, 0.0  ;;  %v1488_v30 = vmul.f32 %v1486_v27, %v1486_v27 }
 0x808   : > { %1490 = vadd.xlane.f32.xlu0 %v1489_v29 }
 0x809   : > { %v1492_v5 = vsel %vm1478_vm8, %v1488_v30, 0.0 }
 0x80c   : > { %1493 = vadd.xlane.f32.xlu0 %v1492_v5 }
 0x895   : > { %v1491_v31 = vpop.xlane.xlu0 %1490 }
 0x896   : > { %v1495_v6 = vmul.f32 0.03125, %v1491_v31 }
 0x898   : > { %v1497_v32 = vadd.f32 1e-05, %v1495_v6 }
 0x899   : > { %v1494_v33 = vpop.xlane.xlu0 %1493 }
 0x89a   : > { %2166 = vrsqrt.f32 %v1497_v32  ;;  %v1496_v34 = vmul.f32 0.03125, %v1494_v33 }
 0x89c   : > { %v1498_v35 = vadd.f32 1e-05, %v1496_v34 }
 0x89e   : > { %2168 = vrsqrt.f32 %v1498_v35 }
 0x8a4   : > { %v2167_v36 = vpop.eup %2166 }
 0x8a5   : > { %v1501_v38 = vmul.f32 %v2167_v36, %v1485_v25 }
 0x8a7   : > { %v1509_v40 = vmul.f32 %v1803_v37, %v1501_v38 }
 0x8a8   : > { %v2169_v41 = vpop.eup %2168 }
 0x8a9   : > { %v1517_v42 = vadd.f32 %v1804_v39, %v1509_v40  ;;  %v1502_v43 = vmul.f32 %v2169_v41, %v1486_v27 }
 0x8ab   : > { %v1510_v44 = vmul.f32 %v1803_v37, %v1502_v43  ;;  %1519 = vst.msk [vmem:[%s659_s5] sm:$0xff] %vm717_vm1, %v1517_v42 }
 0x8ad   : > { %v1518_v45 = vadd.f32 %v1804_v39, %v1510_v44 }
 0x8af   : > { %1520 = vst.msk [vmem:[%s659_s5 + $0x8] sm:$0xf] %vm1478_vm8, %v1518_v45 }
 0x8b0   : > { %2551 = shalt.err (!%p2548_p8)
}
 0x8b1   : > { %s2552_s13 = scalar_lea.hbm %s3299_s22, 256  ;;  %s2556_s12 = scalar_lea.hbm %s3456_s10, 512 }
 0x8b2   : > { %p2553_p3 = scmp.ne.s32.totalorder %s3299_s22, %s2552_s13  ;;  %p2557_p6 = scmp.lt.u32.totalorder %s3299_s22, %s3456_s10 }
 0x8b3   : > { %p2558_p2 = scmp.lt.u32.totalorder %s2556_s12, %s2552_s13  ;;  %p2560_p7 = scmp.lt.u32.totalorder %s2552_s13, %s3299_s22 }
 0x8b4   : > { %p2554_p11 = pnand %p2553_p3, %p3457_p4 }
 0x8b5   : > { %p2559_p9 = por %p2558_p2, %p2557_p6 }
 0x8b6   : > { %p2555_p1 = pneg %p2554_p11 }
 0x8b7   : > { %p2561_p5 = por %p2560_p7, %p2559_p9 }
 0x8b9   : > { %p2562_p10 = pnand %p2561_p5, %p2555_p1 }
 0x8bb   : > { %2565 = shalt.err (!%p2562_p10)
}
 0x8bc   : > { %s2680_s19 = smov 128  }
 0x8bd   : > { %1968 = dma.vmem_to_hbm [thread:$0]  (%p3457_p4), %s3301_s21, 256, %s3299_s22, %s1522_s8, %s2680_s19, %s2680_s19, %s2676_s16  }
 0x8be PF: > { %s1552_s28 = sand.u32 1, %s2632_s25   ;;  %p3458_p12 = scmp.ne.s32.totalorder %s3419_s7, 0 }
 0x8bf   : > { %p3459_p13 = scmp.ge.s32.totalorder %s2652_s30, 2  ;;  %s1553_s1 = scalar_lea.sflag [#allocation4], %s1552_s28 }
 0x8c1   : > { %p2012_p0 = pnand %p3459_p13, %p3458_p12 }
 0x8c3   : > { %2627 = dma.done.wait (!%p2012_p0), %s1553_s1, 256  }
 0x8c4   : > { %2629 = vsyncadd (!%p2012_p0), %s1553_s1, 4294967040  ;;  %s35_s30 = sadd.s32 1, %s2652_s30   ;;  %s3460_s2 = sld [smem:[#allocation36_spill]] }
 0x8c5   : > { %p32_p8 = scmp.ge.s32.totalorder %s35_s30, 4   ;;  %s3461_s25 = smov %s2636_s26 }
 0x8c6   : > { %s3462_s26 = smov %s2640_s27  ;;  %s3463_s27 = smov %s2931_s20 }
 0x8c7   : > { %s3464_s28 = smov %s2648_s29  ;;  %34 = sbr.rel (!%p32_p8) target bundleno = 27 (0x1b), region = 173 }
 0x8ca   : > { %s3465_s29 = smov %s3460_s2 }
 0x8ce   :  { %1558 = vsyncpa [#allocation3], 1 }
 0x8cf   :  { %1560 = vsyncpa [#allocation3 + $0x1], 1 }
 0x8d0   :  { %1561 = vsyncpa [#allocation6], 1 }
 0x8d1   :  { %1562 = vsyncpa [#allocation10], 1 }
 0x8d2   :  { %1563 = vsyncpa [#allocation13], 1 }
 0x8d3   :  { %1564 = vsyncpa [#allocation16], 1 }
 0x8d4   :  { %1565 = vsyncpa [#allocation19], 1 }
 0x8d5   :  { %1566 = vsyncpa [#allocation22], 1 }
 0x8d6   :  { %1567 = vsyncpa [#allocation4], 1 }
 0x8d7   :  { %1569 = vsyncpa [#allocation4 + $0x1], 1 }

</bundles_post_ra>
